<compile_context>
chip_gen: v7x
topology: tpu7x:2x2x1
jax: 0.10.0
libtpu: 0.0.40
codegen_flags: <defaults>
</compile_context>

<pallas_src>
import functools
import math

import jax
import jax.numpy as jnp
from jax.experimental import pallas as pl
from jax.experimental.pallas import tpu as pltpu


# ----------------------------------------------------------------------------
# In-kernel helpers (only ops that lower cleanly in Mosaic).
# ----------------------------------------------------------------------------
def _erf_f32(x):
    """Single-precision erf (Eigen/XLA rational polynomial)."""
    x = jnp.clip(x, -4.0, 4.0)
    x2 = x * x
    p = -2.72614225801306e-10
    p = p * x2 + 2.77068142495902e-08
    p = p * x2 + -2.10102402082508e-06
    p = p * x2 + -5.69250639462346e-05
    p = p * x2 + -7.34990630326855e-04
    p = p * x2 + -2.95459980854025e-03
    p = p * x2 + -1.60960333262415e-02
    p = p * x
    q = -1.45660718464996e-05
    q = q * x2 + -2.13374055278905e-04
    q = q * x2 + -1.68282697438203e-03
    q = q * x2 + -7.37332916720468e-03
    q = q * x2 + -1.42647390514189e-02
    return p / q


def _gelu_exact(x):
    # torch.nn.GELU() default (approximate='none'): 0.5 * x * (1 + erf(x/sqrt(2)))
    return 0.5 * x * (1.0 + _erf_f32(x * 0.7071067811865476))


# ----------------------------------------------------------------------------
# Pallas kernel: single invocation, whole batch resident in VMEM.
# ----------------------------------------------------------------------------
def s4_kernel(u_ref, kpad_ref, w_ref, b_ref, out_ref, kmat_ref, *, matmul_dtype):
    """S4 forward, one step.

    u_ref    : (C*H, B, L)   input, groups-major, batch folded into the block
    kpad_ref : (C*H, 2*L)    conv kernel, left zero-padded, D folded into tap 0
    w_ref    : (2*Hout, C*H) output_linear (1x1 conv) weight
    b_ref    : (2*Hout, 1)   output_linear bias
    out_ref  : (Hout, B*L)   GLU output, lane-major columns (b*L + l)
    kmat_ref : VMEM scratch (C*H, L, L), causal Toeplitz bank
               kmat[h, m, l] = k_eff[h, l - m] if l >= m else 0
    """
    CH, B, L = u_ref.shape
    kpad = kpad_ref[...]                                   # (C*H, 2L)

    # --- synthesize the causal Toeplitz bank from static slices of kpad ------
    # kpad[:, j] = 0 for j < L, k_eff[:, j-L] otherwise, so row m over l is
    # kpad[:, L - m + l] -> a plain static slice.  (At scale this is a per-tile
    # row loop over the L_tile rows; here L is small so it fully unrolls.)
    for m in range(L):
        kmat_ref[:, m, :] = kpad[:, L - m:2 * L - m]

    # --- causal depthwise long conv + skip (D is tap 0), batched over the
    #     C*H groups on the MXU:  y[h,b,l] = sum_m u[h,b,m] * kmat[h,m,l] ------
    y = jnp.einsum(
        'hbm,hml->hbl',
        u_ref[...].astype(matmul_dtype),
        kmat_ref[...].astype(matmul_dtype),
        preferred_element_type=jnp.float32)                # (C*H, B, L) f32

    # --- GELU -> output_linear (1x1 conv, MXU) -> bias -> GLU -----------------
    W = w_ref[...].astype(matmul_dtype)                    # (2*Hout, C*H)
    bias = b_ref[...]                                      # (2*Hout, 1)
    Ho = w_ref.shape[0] // 2
    for b in range(B):                                     # tiny static unroll
        yb = _gelu_exact(y[:, b, :])                       # (C*H, L)
        zb = jnp.dot(W, yb.astype(matmul_dtype),
                     preferred_element_type=jnp.float32) + bias   # (2*Hout, L)
        out_ref[:, b * L:(b + 1) * L] = zb[:Ho, :] * jax.nn.sigmoid(zb[Ho:, :])


def s4_forward(u, k, D, W, bias, *, matmul_dtype=jnp.float32):
    """u: (B, H, L); k: (C, H, L); D: (C, H); W: (2*Hout, C*H); bias: (2*Hout, 1).

    Returns (y, next_state) with y: (B, Hout, L) and next_state=None.
    Set matmul_dtype=jnp.bfloat16 for v6e/v7x MXU rates (f32 accumulation).
    """
    B, H, L = u.shape
    C = k.shape[0]
    CH = C * H
    Hout = W.shape[0] // 2

    # Fold the skip connection D*u into tap 0 of the conv kernel (exact).
    k_eff = k.reshape(CH, L).astype(jnp.float32)
    k_eff = k_eff.at[:, 0].add(D.reshape(CH).astype(jnp.float32))
    # Left-pad with L zeros so causal Toeplitz rows become plain static slices.
    kpad = jnp.concatenate([jnp.zeros((CH, L), jnp.float32), k_eff], axis=1)   # (CH, 2L)

    # (B, H, L) -> (C*H, B, L): broadcast over channels, groups major.
    u_g = jnp.broadcast_to(u[:, None, :, :], (B, C, H, L)).reshape(B, CH, L)
    u_g = jnp.transpose(u_g, (1, 0, 2)).astype(jnp.float32)                    # (CH, B, L)

    W32 = W.astype(jnp.float32)
    bias2 = bias.reshape(2 * Hout, 1).astype(jnp.float32)

    kernel = functools.partial(s4_kernel, matmul_dtype=matmul_dtype)
    out = pl.pallas_call(
        kernel,
        out_shape=jax.ShapeDtypeStruct((Hout, B * L), jnp.float32),
        grid=(1,),  # whole toy problem in one step: no per-grid-step overhead
        in_specs=[
            pl.BlockSpec((CH, B, L), lambda i: (0, 0, 0)),      # u (groups-major)
            pl.BlockSpec((CH, 2 * L), lambda i: (0, 0)),        # padded kernel, O(H*L)
            pl.BlockSpec((2 * Hout, CH), lambda i: (0, 0)),     # output_linear weight
            pl.BlockSpec((2 * Hout, 1), lambda i: (0, 0)),      # output_linear bias
        ],
        out_specs=pl.BlockSpec((Hout, B * L), lambda i: (0, 0)),
        scratch_shapes=[pltpu.VMEM((CH, L, L), jnp.float32)],   # Toeplitz bank
        compiler_params=pltpu.CompilerParams(dimension_semantics=("arbitrary",)),
    )(u_g, kpad, W32, bias2)

    # Layout plumbing back to the module's (B, H, L) — done outside the kernel.
    y = jnp.transpose(out.reshape(Hout, B, L), (1, 0, 2))
    return y, None


# ----------------------------------------------------------------------------
# Parameter setup (glue, plain JAX)
# ----------------------------------------------------------------------------
def make_ssm_kernel(key, channels, H, N, L, dt_min=1e-3, dt_max=1e-1):
    # TODO(synk): full SSKernel (NPLR/HiPPO + Cauchy/Woodbury) replaced by an
    # S4D-style diagonal SSM kernel; output shape/semantics (channels, H, L) match.
    k_dt, k_C = jax.random.split(key)
    log_dt = jax.random.uniform(
        k_dt, (H,), minval=math.log(dt_min), maxval=math.log(dt_max))
    dt = jnp.exp(log_dt)                                          # (H,)
    A = -0.5 + 1j * math.pi * jnp.arange(N // 2)                  # (N/2,)
    Cr = jax.random.normal(k_C, (channels, H, N // 2, 2))
    Cc = (Cr[..., 0] + 1j * Cr[..., 1]) * (2.0 ** -0.5)           # (C, H, N/2)
    dtA = dt[:, None] * A[None, :]                                # (H, N/2)
    dB = (jnp.exp(dtA) - 1.0) / A[None, :]                        # ZOH, B = 1
    l = jnp.arange(L)
    dA_pow = jnp.exp(dtA[:, :, None] * l[None, None, :])          # (H, N/2, L)
    k = 2.0 * jnp.real(jnp.einsum('chn,hnl->chl', Cc * dB[None], dA_pow))
    return k.astype(jnp.float32)                                  # (C, H, L)


# ----------------------------------------------------------------------------
# Pure-JAX reference (mirrors the PyTorch forward exactly, incl. FFT conv)
# ----------------------------------------------------------------------------
def s4_reference(u, k, D, W, bias):
    B, H, L = u.shape
    C = k.shape[0]
    n = 2 * L
    k_f = jnp.fft.rfft(k, n=n)
    u_f = jnp.fft.rfft(u, n=n)
    y_f = jnp.einsum('bhl,chl->bchl', u_f, k_f)
    y = jnp.fft.irfft(y_f, n=n)[..., :L]
    y = y + jnp.einsum('bhl,ch->bchl', u, D)
    y = y.reshape(B, C * H, L)
    y = jax.nn.gelu(y, approximate=False)
    z = jnp.sum(W[None, :, :, None] * y[:, None, :, :], axis=2) + bias[None]
    Ho = W.shape[0] // 2
    return z[:, :Ho] * jax.nn.sigmoid(z[:, Ho:])


# ----------------------------------------------------------------------------
if __name__ == "__main__":
    # Small shapes consistent with the module: B=2, d_model(H)=8, d_state(N)=16,
    # L=16, channels=1, defaults (gelu + glu postact, no gate/bottleneck/bidir).
    B, d_model, d_state, L, channels = 2, 8, 16, 16, 1

    key = jax.random.PRNGKey(0)
    k_u, k_D, k_ssm, k_W, k_b = jax.random.split(key, 5)

    u = jax.random.normal(k_u, (B, d_model, L), jnp.float32)            # input
    D = jax.random.normal(k_D, (channels, d_model), jnp.float32)        # skip param
    kern = make_ssm_kernel(k_ssm, channels, d_model, d_state, L)        # (C, H, L)

    bound = 1.0 / math.sqrt(d_model)                                    # Conv1d-style init
    W = jax.random.uniform(k_W, (2 * d_model, channels * d_model), jnp.float32,
                           minval=-bound, maxval=bound)
    bias = jax.random.uniform(k_b, (2 * d_model, 1), jnp.float32,
                              minval=-bound, maxval=bound)

    out, next_state = s4_forward(u, kern, D, W, bias)
    out = jax.block_until_ready(out)

    ref = s4_reference(u, kern, D, W, bias)
    assert out.shape == (B, d_model, L)
    assert next_state is None
    if not bool(jnp.allclose(out, ref, rtol=1e-3, atol=1e-3)):
        raise AssertionError("Pallas S4 kernel does not match JAX reference")

    print("KERNEL_OK")
</pallas_src>

<mosaic_0001>
module attributes {stable_mosaic.version = 11 : i64} {
  func.func @s4_kernel(%arg0: i32, %arg1: memref<8x2x16xf32, #tpu.memory_space<vmem>>, %arg2: memref<8x32xf32, #tpu.memory_space<vmem>>, %arg3: memref<16x8xf32, #tpu.memory_space<vmem>>, %arg4: memref<16x1xf32, #tpu.memory_space<vmem>>, %arg5: memref<8x32xf32, #tpu.memory_space<vmem>>, %arg6: memref<8x16x16xf32, #tpu.memory_space<vmem>>) attributes {dimension_semantics = [#tpu.dimension_semantics<arbitrary>], iteration_bounds = array<i64: 1>, scalar_prefetch = 0 : i64, scratch_operands = 1 : i64, tpu.core_type = #tpu.core_type<tc>, window_params = [{pipeline_mode = #tpu.pipeline_mode<synchronous>, transform_indices = @transform_0, window_bounds = array<i64: 8, 2, 16>}, {pipeline_mode = #tpu.pipeline_mode<synchronous>, transform_indices = @transform_1, window_bounds = array<i64: 8, 32>}, {pipeline_mode = #tpu.pipeline_mode<synchronous>, transform_indices = @transform_2, window_bounds = array<i64: 16, 8>}, {pipeline_mode = #tpu.pipeline_mode<synchronous>, transform_indices = @transform_3, window_bounds = array<i64: 16, 1>}, {pipeline_mode = #tpu.pipeline_mode<synchronous>, transform_indices = @transform_4, window_bounds = array<i64: 8, 32>}]} {
    %c0 = arith.constant 0 : index
    %c0_0 = arith.constant 0 : index
    %0 = vector.load %arg2[%c0, %c0_0] : memref<8x32xf32, #tpu.memory_space<vmem>>, vector<8x32xf32>
    %1 = vector.extract_strided_slice %0 {offsets = [0, 16], sizes = [8, 16], strides = [1, 1]} : vector<8x32xf32> to vector<8x16xf32>
    %c0_1 = arith.constant 0 : index
    %c0_2 = arith.constant 0 : index
    %c0_3 = arith.constant 0 : index
    %2 = vector.load %arg6[%c0_1, %c0_2, %c0_3] : memref<8x16x16xf32, #tpu.memory_space<vmem>>, vector<8x1x16xf32>
    %3 = vector.shape_cast %2 : vector<8x1x16xf32> to vector<8x16xf32>
    %4 = vector.shape_cast %1 : vector<8x16xf32> to vector<8x1x16xf32>
    tpu.vector_store %arg6[%c0_1, %c0_2, %c0_3], %4 {strides = array<i32>} : memref<8x16x16xf32, #tpu.memory_space<vmem>>, vector<8x1x16xf32>,
    %5 = vector.extract_strided_slice %0 {offsets = [0, 15], sizes = [8, 16], strides = [1, 1]} : vector<8x32xf32> to vector<8x16xf32>
    %c0_4 = arith.constant 0 : index
    %c1 = arith.constant 1 : index
    %c0_5 = arith.constant 0 : index
    %6 = vector.load %arg6[%c0_4, %c1, %c0_5] : memref<8x16x16xf32, #tpu.memory_space<vmem>>, vector<8x1x16xf32>
    %7 = vector.shape_cast %6 : vector<8x1x16xf32> to vector<8x16xf32>
    %8 = vector.shape_cast %5 : vector<8x16xf32> to vector<8x1x16xf32>
    tpu.vector_store %arg6[%c0_4, %c1, %c0_5], %8 {strides = array<i32>} : memref<8x16x16xf32, #tpu.memory_space<vmem>>, vector<8x1x16xf32>,
    %9 = vector.extract_strided_slice %0 {offsets = [0, 14], sizes = [8, 16], strides = [1, 1]} : vector<8x32xf32> to vector<8x16xf32>
    %c0_6 = arith.constant 0 : index
    %c2 = arith.constant 2 : index
    %c0_7 = arith.constant 0 : index
    %10 = vector.load %arg6[%c0_6, %c2, %c0_7] : memref<8x16x16xf32, #tpu.memory_space<vmem>>, vector<8x1x16xf32>
    %11 = vector.shape_cast %10 : vector<8x1x16xf32> to vector<8x16xf32>
    %12 = vector.shape_cast %9 : vector<8x16xf32> to vector<8x1x16xf32>
    tpu.vector_store %arg6[%c0_6, %c2, %c0_7], %12 {strides = array<i32>} : memref<8x16x16xf32, #tpu.memory_space<vmem>>, vector<8x1x16xf32>,
    %13 = vector.extract_strided_slice %0 {offsets = [0, 13], sizes = [8, 16], strides = [1, 1]} : vector<8x32xf32> to vector<8x16xf32>
    %c0_8 = arith.constant 0 : index
    %c3 = arith.constant 3 : index
    %c0_9 = arith.constant 0 : index
    %14 = vector.load %arg6[%c0_8, %c3, %c0_9] : memref<8x16x16xf32, #tpu.memory_space<vmem>>, vector<8x1x16xf32>
    %15 = vector.shape_cast %14 : vector<8x1x16xf32> to vector<8x16xf32>
    %16 = vector.shape_cast %13 : vector<8x16xf32> to vector<8x1x16xf32>
    tpu.vector_store %arg6[%c0_8, %c3, %c0_9], %16 {strides = array<i32>} : memref<8x16x16xf32, #tpu.memory_space<vmem>>, vector<8x1x16xf32>,
    %17 = vector.extract_strided_slice %0 {offsets = [0, 12], sizes = [8, 16], strides = [1, 1]} : vector<8x32xf32> to vector<8x16xf32>
    %c0_10 = arith.constant 0 : index
    %c4 = arith.constant 4 : index
    %c0_11 = arith.constant 0 : index
    %18 = vector.load %arg6[%c0_10, %c4, %c0_11] : memref<8x16x16xf32, #tpu.memory_space<vmem>>, vector<8x1x16xf32>
    %19 = vector.shape_cast %18 : vector<8x1x16xf32> to vector<8x16xf32>
    %20 = vector.shape_cast %17 : vector<8x16xf32> to vector<8x1x16xf32>
    tpu.vector_store %arg6[%c0_10, %c4, %c0_11], %20 {strides = array<i32>} : memref<8x16x16xf32, #tpu.memory_space<vmem>>, vector<8x1x16xf32>,
    %21 = vector.extract_strided_slice %0 {offsets = [0, 11], sizes = [8, 16], strides = [1, 1]} : vector<8x32xf32> to vector<8x16xf32>
    %c0_12 = arith.constant 0 : index
    %c5 = arith.constant 5 : index
    %c0_13 = arith.constant 0 : index
    %22 = vector.load %arg6[%c0_12, %c5, %c0_13] : memref<8x16x16xf32, #tpu.memory_space<vmem>>, vector<8x1x16xf32>
    %23 = vector.shape_cast %22 : vector<8x1x16xf32> to vector<8x16xf32>
    %24 = vector.shape_cast %21 : vector<8x16xf32> to vector<8x1x16xf32>
    tpu.vector_store %arg6[%c0_12, %c5, %c0_13], %24 {strides = array<i32>} : memref<8x16x16xf32, #tpu.memory_space<vmem>>, vector<8x1x16xf32>,
    %25 = vector.extract_strided_slice %0 {offsets = [0, 10], sizes = [8, 16], strides = [1, 1]} : vector<8x32xf32> to vector<8x16xf32>
    %c0_14 = arith.constant 0 : index
    %c6 = arith.constant 6 : index
    %c0_15 = arith.constant 0 : index
    %26 = vector.load %arg6[%c0_14, %c6, %c0_15] : memref<8x16x16xf32, #tpu.memory_space<vmem>>, vector<8x1x16xf32>
    %27 = vector.shape_cast %26 : vector<8x1x16xf32> to vector<8x16xf32>
    %28 = vector.shape_cast %25 : vector<8x16xf32> to vector<8x1x16xf32>
    tpu.vector_store %arg6[%c0_14, %c6, %c0_15], %28 {strides = array<i32>} : memref<8x16x16xf32, #tpu.memory_space<vmem>>, vector<8x1x16xf32>,
    %29 = vector.extract_strided_slice %0 {offsets = [0, 9], sizes = [8, 16], strides = [1, 1]} : vector<8x32xf32> to vector<8x16xf32>
    %c0_16 = arith.constant 0 : index
    %c7 = arith.constant 7 : index
    %c0_17 = arith.constant 0 : index
    %30 = vector.load %arg6[%c0_16, %c7, %c0_17] : memref<8x16x16xf32, #tpu.memory_space<vmem>>, vector<8x1x16xf32>
    %31 = vector.shape_cast %30 : vector<8x1x16xf32> to vector<8x16xf32>
    %32 = vector.shape_cast %29 : vector<8x16xf32> to vector<8x1x16xf32>
    tpu.vector_store %arg6[%c0_16, %c7, %c0_17], %32 {strides = array<i32>} : memref<8x16x16xf32, #tpu.memory_space<vmem>>, vector<8x1x16xf32>,
    %33 = vector.extract_strided_slice %0 {offsets = [0, 8], sizes = [8, 16], strides = [1, 1]} : vector<8x32xf32> to vector<8x16xf32>
    %c0_18 = arith.constant 0 : index
    %c8 = arith.constant 8 : index
    %c0_19 = arith.constant 0 : index
    %34 = vector.load %arg6[%c0_18, %c8, %c0_19] : memref<8x16x16xf32, #tpu.memory_space<vmem>>, vector<8x1x16xf32>
    %35 = vector.shape_cast %34 : vector<8x1x16xf32> to vector<8x16xf32>
    %36 = vector.shape_cast %33 : vector<8x16xf32> to vector<8x1x16xf32>
    tpu.vector_store %arg6[%c0_18, %c8, %c0_19], %36 {strides = array<i32>} : memref<8x16x16xf32, #tpu.memory_space<vmem>>, vector<8x1x16xf32>,
    %37 = vector.extract_strided_slice %0 {offsets = [0, 7], sizes = [8, 16], strides = [1, 1]} : vector<8x32xf32> to vector<8x16xf32>
    %c0_20 = arith.constant 0 : index
    %c9 = arith.constant 9 : index
    %c0_21 = arith.constant 0 : index
    %38 = vector.load %arg6[%c0_20, %c9, %c0_21] : memref<8x16x16xf32, #tpu.memory_space<vmem>>, vector<8x1x16xf32>
    %39 = vector.shape_cast %38 : vector<8x1x16xf32> to vector<8x16xf32>
    %40 = vector.shape_cast %37 : vector<8x16xf32> to vector<8x1x16xf32>
    tpu.vector_store %arg6[%c0_20, %c9, %c0_21], %40 {strides = array<i32>} : memref<8x16x16xf32, #tpu.memory_space<vmem>>, vector<8x1x16xf32>,
    %41 = vector.extract_strided_slice %0 {offsets = [0, 6], sizes = [8, 16], strides = [1, 1]} : vector<8x32xf32> to vector<8x16xf32>
    %c0_22 = arith.constant 0 : index
    %c10 = arith.constant 10 : index
    %c0_23 = arith.constant 0 : index
    %42 = vector.load %arg6[%c0_22, %c10, %c0_23] : memref<8x16x16xf32, #tpu.memory_space<vmem>>, vector<8x1x16xf32>
    %43 = vector.shape_cast %42 : vector<8x1x16xf32> to vector<8x16xf32>
    %44 = vector.shape_cast %41 : vector<8x16xf32> to vector<8x1x16xf32>
    tpu.vector_store %arg6[%c0_22, %c10, %c0_23], %44 {strides = array<i32>} : memref<8x16x16xf32, #tpu.memory_space<vmem>>, vector<8x1x16xf32>,
    %45 = vector.extract_strided_slice %0 {offsets = [0, 5], sizes = [8, 16], strides = [1, 1]} : vector<8x32xf32> to vector<8x16xf32>
    %c0_24 = arith.constant 0 : index
    %c11 = arith.constant 11 : index
    %c0_25 = arith.constant 0 : index
    %46 = vector.load %arg6[%c0_24, %c11, %c0_25] : memref<8x16x16xf32, #tpu.memory_space<vmem>>, vector<8x1x16xf32>
    %47 = vector.shape_cast %46 : vector<8x1x16xf32> to vector<8x16xf32>
    %48 = vector.shape_cast %45 : vector<8x16xf32> to vector<8x1x16xf32>
    tpu.vector_store %arg6[%c0_24, %c11, %c0_25], %48 {strides = array<i32>} : memref<8x16x16xf32, #tpu.memory_space<vmem>>, vector<8x1x16xf32>,
    %49 = vector.extract_strided_slice %0 {offsets = [0, 4], sizes = [8, 16], strides = [1, 1]} : vector<8x32xf32> to vector<8x16xf32>
    %c0_26 = arith.constant 0 : index
    %c12 = arith.constant 12 : index
    %c0_27 = arith.constant 0 : index
    %50 = vector.load %arg6[%c0_26, %c12, %c0_27] : memref<8x16x16xf32, #tpu.memory_space<vmem>>, vector<8x1x16xf32>
    %51 = vector.shape_cast %50 : vector<8x1x16xf32> to vector<8x16xf32>
    %52 = vector.shape_cast %49 : vector<8x16xf32> to vector<8x1x16xf32>
    tpu.vector_store %arg6[%c0_26, %c12, %c0_27], %52 {strides = array<i32>} : memref<8x16x16xf32, #tpu.memory_space<vmem>>, vector<8x1x16xf32>,
    %53 = vector.extract_strided_slice %0 {offsets = [0, 3], sizes = [8, 16], strides = [1, 1]} : vector<8x32xf32> to vector<8x16xf32>
    %c0_28 = arith.constant 0 : index
    %c13 = arith.constant 13 : index
    %c0_29 = arith.constant 0 : index
    %54 = vector.load %arg6[%c0_28, %c13, %c0_29] : memref<8x16x16xf32, #tpu.memory_space<vmem>>, vector<8x1x16xf32>
    %55 = vector.shape_cast %54 : vector<8x1x16xf32> to vector<8x16xf32>
    %56 = vector.shape_cast %53 : vector<8x16xf32> to vector<8x1x16xf32>
    tpu.vector_store %arg6[%c0_28, %c13, %c0_29], %56 {strides = array<i32>} : memref<8x16x16xf32, #tpu.memory_space<vmem>>, vector<8x1x16xf32>,
    %57 = vector.extract_strided_slice %0 {offsets = [0, 2], sizes = [8, 16], strides = [1, 1]} : vector<8x32xf32> to vector<8x16xf32>
    %c0_30 = arith.constant 0 : index
    %c14 = arith.constant 14 : index
    %c0_31 = arith.constant 0 : index
    %58 = vector.load %arg6[%c0_30, %c14, %c0_31] : memref<8x16x16xf32, #tpu.memory_space<vmem>>, vector<8x1x16xf32>
    %59 = vector.shape_cast %58 : vector<8x1x16xf32> to vector<8x16xf32>
    %60 = vector.shape_cast %57 : vector<8x16xf32> to vector<8x1x16xf32>
    tpu.vector_store %arg6[%c0_30, %c14, %c0_31], %60 {strides = array<i32>} : memref<8x16x16xf32, #tpu.memory_space<vmem>>, vector<8x1x16xf32>,
    %61 = vector.extract_strided_slice %0 {offsets = [0, 1], sizes = [8, 16], strides = [1, 1]} : vector<8x32xf32> to vector<8x16xf32>
    %c0_32 = arith.constant 0 : index
    %c15 = arith.constant 15 : index
    %c0_33 = arith.constant 0 : index
    %62 = vector.load %arg6[%c0_32, %c15, %c0_33] : memref<8x16x16xf32, #tpu.memory_space<vmem>>, vector<8x1x16xf32>
    %63 = vector.shape_cast %62 : vector<8x1x16xf32> to vector<8x16xf32>
    %64 = vector.shape_cast %61 : vector<8x16xf32> to vector<8x1x16xf32>
    tpu.vector_store %arg6[%c0_32, %c15, %c0_33], %64 {strides = array<i32>} : memref<8x16x16xf32, #tpu.memory_space<vmem>>, vector<8x1x16xf32>,
    %c0_34 = arith.constant 0 : index
    %c0_35 = arith.constant 0 : index
    %c0_36 = arith.constant 0 : index
    %65 = vector.load %arg1[%c0_34, %c0_35, %c0_36] : memref<8x2x16xf32, #tpu.memory_space<vmem>>, vector<8x2x16xf32>
    %c0_37 = arith.constant 0 : index
    %c0_38 = arith.constant 0 : index
    %c0_39 = arith.constant 0 : index
    %66 = vector.load %arg6[%c0_37, %c0_38, %c0_39] : memref<8x16x16xf32, #tpu.memory_space<vmem>>, vector<8x16x16xf32>
    "tpu.trace_start"() <{level = 10 : i32, message = "hbm,hml->hbl"}> : () -> ()
    %cst = arith.constant dense<0.000000e+00> : vector<8x2x16xf32>
    %67 = tpu.matmul %65, %66, %cst {dimension_numbers = #tpu.dot_dimension_numbers<[2], [1], [1], [2], [0, 0, 0, 1, 1, 2], [0], [0]>} : vector<8x2x16xf32>, vector<8x16x16xf32>, vector<8x2x16xf32> -> vector<8x2x16xf32>
    "tpu.trace_stop"() : () -> ()
    %c0_40 = arith.constant 0 : index
    %c0_41 = arith.constant 0 : index
    %68 = vector.load %arg3[%c0_40, %c0_41] : memref<16x8xf32, #tpu.memory_space<vmem>>, vector<16x8xf32>
    %c0_42 = arith.constant 0 : index
    %c0_43 = arith.constant 0 : index
    %69 = vector.load %arg4[%c0_42, %c0_43] : memref<16x1xf32, #tpu.memory_space<vmem>>, vector<16x1xf32>
    %70 = vector.extract_strided_slice %67 {offsets = [0, 0, 0], sizes = [8, 1, 16], strides = [1, 1, 1]} : vector<8x2x16xf32> to vector<8x1x16xf32>
    %71 = vector.shape_cast %70 : vector<8x1x16xf32> to vector<8x16xf32>
    %cst_44 = arith.constant 5.000000e-01 : f32
    %72 = vector.broadcast %cst_44 : f32 to vector<8x16xf32>
    %73 = arith.mulf %72, %71 : vector<8x16xf32>
    %cst_45 = arith.constant 0.707106769 : f32
    %74 = vector.broadcast %cst_45 : f32 to vector<8x16xf32>
    %75 = arith.mulf %71, %74 : vector<8x16xf32>
    %cst_46 = arith.constant -4.000000e+00 : f32
    %cst_47 = arith.constant 4.000000e+00 : f32
    %76 = vector.broadcast %cst_46 : f32 to vector<8x16xf32>
    %77 = arith.maximumf %76, %75 : vector<8x16xf32>
    %78 = vector.broadcast %cst_47 : f32 to vector<8x16xf32>
    %79 = arith.minimumf %78, %77 : vector<8x16xf32>
    %80 = arith.mulf %79, %79 : vector<8x16xf32>
    %cst_48 = arith.constant -2.72614237E-10 : f32
    %81 = vector.broadcast %cst_48 : f32 to vector<8x16xf32>
    %82 = arith.mulf %81, %80 : vector<8x16xf32>
    %cst_49 = arith.constant 2.77068146E-8 : f32
    %83 = vector.broadcast %cst_49 : f32 to vector<8x16xf32>
    %84 = arith.addf %82, %83 : vector<8x16xf32>
    %85 = arith.mulf %84, %80 : vector<8x16xf32>
    %cst_50 = arith.constant -2.10102394E-6 : f32
    %86 = vector.broadcast %cst_50 : f32 to vector<8x16xf32>
    %87 = arith.addf %85, %86 : vector<8x16xf32>
    %88 = arith.mulf %87, %80 : vector<8x16xf32>
    %cst_51 = arith.constant -5.69250624E-5 : f32
    %89 = vector.broadcast %cst_51 : f32 to vector<8x16xf32>
    %90 = arith.addf %88, %89 : vector<8x16xf32>
    %91 = arith.mulf %90, %80 : vector<8x16xf32>
    %cst_52 = arith.constant -7.34990637E-4 : f32
    %92 = vector.broadcast %cst_52 : f32 to vector<8x16xf32>
    %93 = arith.addf %91, %92 : vector<8x16xf32>
    %94 = arith.mulf %93, %80 : vector<8x16xf32>
    %cst_53 = arith.constant -2.954600e-03 : f32
    %95 = vector.broadcast %cst_53 : f32 to vector<8x16xf32>
    %96 = arith.addf %94, %95 : vector<8x16xf32>
    %97 = arith.mulf %96, %80 : vector<8x16xf32>
    %cst_54 = arith.constant -0.0160960332 : f32
    %98 = vector.broadcast %cst_54 : f32 to vector<8x16xf32>
    %99 = arith.addf %97, %98 : vector<8x16xf32>
    %100 = arith.mulf %99, %79 : vector<8x16xf32>
    %cst_55 = arith.constant -1.45660715E-5 : f32
    %101 = vector.broadcast %cst_55 : f32 to vector<8x16xf32>
    %102 = arith.mulf %101, %80 : vector<8x16xf32>
    %cst_56 = arith.constant -2.13374049E-4 : f32
    %103 = vector.broadcast %cst_56 : f32 to vector<8x16xf32>
    %104 = arith.addf %102, %103 : vector<8x16xf32>
    %105 = arith.mulf %104, %80 : vector<8x16xf32>
    %cst_57 = arith.constant -0.00168282702 : f32
    %106 = vector.broadcast %cst_57 : f32 to vector<8x16xf32>
    %107 = arith.addf %105, %106 : vector<8x16xf32>
    %108 = arith.mulf %107, %80 : vector<8x16xf32>
    %cst_58 = arith.constant -0.00737332925 : f32
    %109 = vector.broadcast %cst_58 : f32 to vector<8x16xf32>
    %110 = arith.addf %108, %109 : vector<8x16xf32>
    %111 = arith.mulf %110, %80 : vector<8x16xf32>
    %cst_59 = arith.constant -0.0142647391 : f32
    %112 = vector.broadcast %cst_59 : f32 to vector<8x16xf32>
    %113 = arith.addf %111, %112 : vector<8x16xf32>
    %114 = arith.divf %100, %113 : vector<8x16xf32>
    %cst_60 = arith.constant 1.000000e+00 : f32
    %115 = vector.broadcast %cst_60 : f32 to vector<8x16xf32>
    %116 = arith.addf %115, %114 : vector<8x16xf32>
    %117 = arith.mulf %73, %116 : vector<8x16xf32>
    %cst_61 = arith.constant dense<0.000000e+00> : vector<16x16xf32>
    %118 = tpu.matmul %68, %117, %cst_61 {dimension_numbers = #tpu.dot_dimension_numbers<[1], [0], [0], [1], [0, 0, 1, 1], [], []>} : vector<16x8xf32>, vector<8x16xf32>, vector<16x16xf32> -> vector<16x16xf32>
    %119 = vector.broadcast %69 : vector<16x1xf32> to vector<16x16xf32>
    %120 = arith.addf %118, %119 : vector<16x16xf32>
    %121 = vector.extract_strided_slice %120 {offsets = [0, 0], sizes = [8, 16], strides = [1, 1]} : vector<16x16xf32> to vector<8x16xf32>
    %122 = vector.extract_strided_slice %120 {offsets = [8, 0], sizes = [8, 16], strides = [1, 1]} : vector<16x16xf32> to vector<8x16xf32>
    %123 = arith.negf %122 : vector<8x16xf32>
    %124 = math.exp %123 : vector<8x16xf32>
    %cst_62 = arith.constant 1.000000e+00 : f32
    %125 = vector.broadcast %cst_62 : f32 to vector<8x16xf32>
    %126 = arith.addf %125, %124 : vector<8x16xf32>
    %127 = arith.divf %125, %126 : vector<8x16xf32>
    %128 = arith.mulf %121, %127 : vector<8x16xf32>
    %c0_63 = arith.constant 0 : index
    %c0_64 = arith.constant 0 : index
    %129 = vector.load %arg5[%c0_63, %c0_64] : memref<8x32xf32, #tpu.memory_space<vmem>>, vector<8x16xf32>
    tpu.vector_store %arg5[%c0_63, %c0_64], %128 {strides = array<i32>} : memref<8x32xf32, #tpu.memory_space<vmem>>, vector<8x16xf32>,
    %130 = vector.extract_strided_slice %67 {offsets = [0, 1, 0], sizes = [8, 1, 16], strides = [1, 1, 1]} : vector<8x2x16xf32> to vector<8x1x16xf32>
    %131 = vector.shape_cast %130 : vector<8x1x16xf32> to vector<8x16xf32>
    %cst_65 = arith.constant 5.000000e-01 : f32
    %132 = vector.broadcast %cst_65 : f32 to vector<8x16xf32>
    %133 = arith.mulf %132, %131 : vector<8x16xf32>
    %cst_66 = arith.constant 0.707106769 : f32
    %134 = vector.broadcast %cst_66 : f32 to vector<8x16xf32>
    %135 = arith.mulf %131, %134 : vector<8x16xf32>
    %cst_67 = arith.constant -4.000000e+00 : f32
    %cst_68 = arith.constant 4.000000e+00 : f32
    %136 = vector.broadcast %cst_67 : f32 to vector<8x16xf32>
    %137 = arith.maximumf %136, %135 : vector<8x16xf32>
    %138 = vector.broadcast %cst_68 : f32 to vector<8x16xf32>
    %139 = arith.minimumf %138, %137 : vector<8x16xf32>
    %140 = arith.mulf %139, %139 : vector<8x16xf32>
    %cst_69 = arith.constant -2.72614237E-10 : f32
    %141 = vector.broadcast %cst_69 : f32 to vector<8x16xf32>
    %142 = arith.mulf %141, %140 : vector<8x16xf32>
    %cst_70 = arith.constant 2.77068146E-8 : f32
    %143 = vector.broadcast %cst_70 : f32 to vector<8x16xf32>
    %144 = arith.addf %142, %143 : vector<8x16xf32>
    %145 = arith.mulf %144, %140 : vector<8x16xf32>
    %cst_71 = arith.constant -2.10102394E-6 : f32
    %146 = vector.broadcast %cst_71 : f32 to vector<8x16xf32>
    %147 = arith.addf %145, %146 : vector<8x16xf32>
    %148 = arith.mulf %147, %140 : vector<8x16xf32>
    %cst_72 = arith.constant -5.69250624E-5 : f32
    %149 = vector.broadcast %cst_72 : f32 to vector<8x16xf32>
    %150 = arith.addf %148, %149 : vector<8x16xf32>
    %151 = arith.mulf %150, %140 : vector<8x16xf32>
    %cst_73 = arith.constant -7.34990637E-4 : f32
    %152 = vector.broadcast %cst_73 : f32 to vector<8x16xf32>
    %153 = arith.addf %151, %152 : vector<8x16xf32>
    %154 = arith.mulf %153, %140 : vector<8x16xf32>
    %cst_74 = arith.constant -2.954600e-03 : f32
    %155 = vector.broadcast %cst_74 : f32 to vector<8x16xf32>
    %156 = arith.addf %154, %155 : vector<8x16xf32>
    %157 = arith.mulf %156, %140 : vector<8x16xf32>
    %cst_75 = arith.constant -0.0160960332 : f32
    %158 = vector.broadcast %cst_75 : f32 to vector<8x16xf32>
    %159 = arith.addf %157, %158 : vector<8x16xf32>
    %160 = arith.mulf %159, %139 : vector<8x16xf32>
    %cst_76 = arith.constant -1.45660715E-5 : f32
    %161 = vector.broadcast %cst_76 : f32 to vector<8x16xf32>
    %162 = arith.mulf %161, %140 : vector<8x16xf32>
    %cst_77 = arith.constant -2.13374049E-4 : f32
    %163 = vector.broadcast %cst_77 : f32 to vector<8x16xf32>
    %164 = arith.addf %162, %163 : vector<8x16xf32>
    %165 = arith.mulf %164, %140 : vector<8x16xf32>
    %cst_78 = arith.constant -0.00168282702 : f32
    %166 = vector.broadcast %cst_78 : f32 to vector<8x16xf32>
    %167 = arith.addf %165, %166 : vector<8x16xf32>
    %168 = arith.mulf %167, %140 : vector<8x16xf32>
    %cst_79 = arith.constant -0.00737332925 : f32
    %169 = vector.broadcast %cst_79 : f32 to vector<8x16xf32>
    %170 = arith.addf %168, %169 : vector<8x16xf32>
    %171 = arith.mulf %170, %140 : vector<8x16xf32>
    %cst_80 = arith.constant -0.0142647391 : f32
    %172 = vector.broadcast %cst_80 : f32 to vector<8x16xf32>
    %173 = arith.addf %171, %172 : vector<8x16xf32>
    %174 = arith.divf %160, %173 : vector<8x16xf32>
    %cst_81 = arith.constant 1.000000e+00 : f32
    %175 = vector.broadcast %cst_81 : f32 to vector<8x16xf32>
    %176 = arith.addf %175, %174 : vector<8x16xf32>
    %177 = arith.mulf %133, %176 : vector<8x16xf32>
    %cst_82 = arith.constant dense<0.000000e+00> : vector<16x16xf32>
    %178 = tpu.matmul %68, %177, %cst_82 {dimension_numbers = #tpu.dot_dimension_numbers<[1], [0], [0], [1], [0, 0, 1, 1], [], []>} : vector<16x8xf32>, vector<8x16xf32>, vector<16x16xf32> -> vector<16x16xf32>
    %179 = vector.broadcast %69 : vector<16x1xf32> to vector<16x16xf32>
    %180 = arith.addf %178, %179 : vector<16x16xf32>
    %181 = vector.extract_strided_slice %180 {offsets = [0, 0], sizes = [8, 16], strides = [1, 1]} : vector<16x16xf32> to vector<8x16xf32>
    %182 = vector.extract_strided_slice %180 {offsets = [8, 0], sizes = [8, 16], strides = [1, 1]} : vector<16x16xf32> to vector<8x16xf32>
    %183 = arith.negf %182 : vector<8x16xf32>
    %184 = math.exp %183 : vector<8x16xf32>
    %cst_83 = arith.constant 1.000000e+00 : f32
    %185 = vector.broadcast %cst_83 : f32 to vector<8x16xf32>
    %186 = arith.addf %185, %184 : vector<8x16xf32>
    %187 = arith.divf %185, %186 : vector<8x16xf32>
    %188 = arith.mulf %181, %187 : vector<8x16xf32>
    %c0_84 = arith.constant 0 : index
    %c16 = arith.constant 16 : index
    %189 = vector.load %arg5[%c0_84, %c16] : memref<8x32xf32, #tpu.memory_space<vmem>>, vector<8x16xf32>
    tpu.vector_store %arg5[%c0_84, %c16], %188 {strides = array<i32>} : memref<8x32xf32, #tpu.memory_space<vmem>>, vector<8x16xf32>,
    return
  }
  func.func @transform_0(%arg0: i32) -> (i32, i32, i32) {
    %c0_i32 = arith.constant 0 : i32
    %c0_i32_0 = arith.constant 0 : i32
    %c0_i32_1 = arith.constant 0 : i32
    %c0_i32_2 = arith.constant 0 : i32
    return %c0_i32, %c0_i32_0, %c0_i32_1 : i32, i32, i32
  }
  func.func @transform_1(%arg0: i32) -> (i32, i32) {
    %c0_i32 = arith.constant 0 : i32
    %c0_i32_0 = arith.constant 0 : i32
    %c0_i32_1 = arith.constant 0 : i32
    return %c0_i32, %c0_i32_0 : i32, i32
  }
  func.func @transform_2(%arg0: i32) -> (i32, i32) {
    %c0_i32 = arith.constant 0 : i32
    %c0_i32_0 = arith.constant 0 : i32
    %c0_i32_1 = arith.constant 0 : i32
    return %c0_i32, %c0_i32_0 : i32, i32
  }
  func.func @transform_3(%arg0: i32) -> (i32, i32) {
    %c0_i32 = arith.constant 0 : i32
    %c0_i32_0 = arith.constant 0 : i32
    %c0_i32_1 = arith.constant 0 : i32
    return %c0_i32, %c0_i32_0 : i32, i32
  }
  func.func @transform_4(%arg0: i32) -> (i32, i32) {
    %c0_i32 = arith.constant 0 : i32
    %c0_i32_0 = arith.constant 0 : i32
    %c0_i32_1 = arith.constant 0 : i32
    return %c0_i32, %c0_i32_0 : i32, i32
  }
}

</mosaic_0001>

<bundles_post_ra>
// kernel: tpu_custom_call.1
= control target key start
LH: loop header
LB: loop body
LE: loop exit
PB: predicated region body
PF: predicated region fallthrough
CT: control target
= control target key end

     0   :  { %v24_v0 = vlaneseq  ;;  %v1929_v1 = vmov 1966171168   ;;  %s2341_s0 = inlined_call_operand.vmem [shape: f32[8,2,16], index: 0, kind: input, shape index: {}]   ;;  %s2342_s1 = inlined_call_operand.vmem [shape: f32[8,32], index: 1, kind: input, shape index: {}]   ;;  %s2343_s2 = inlined_call_operand.vmem [shape: f32[16,8], index: 2, kind: input, shape index: {}]   ;;  %s2344_s3 = inlined_call_operand.vmem [shape: f32[16,1], index: 3, kind: input, shape index: {}]   ;;  %s2345_s4 = inlined_call_operand.hbm [shape: f32[8,32], index: 4, kind: output, shape index: {}]  }
   0x1   :  { %v22_v2 = vunpack.c.l.s4 %v1929_v1 }
   0x2   :  { %9 = vsyncpa [#allocation4], 0  ;;  %v25_v3 = vshrl.u32 %v24_v0, 7  ;;  %v18_v5 = vld [vmem:[%s2342_s1] sm:$0xff]  ;;  %s1930_s17 = smov 114   ;;  %s1931_s18 = smov 112  }
   0x3   :  { %v23_v4 = vunpack.c.0.s8 %v22_v2  ;;  %v20_v7 = vcombine.high %v18_v5, %v18_v5  ;;  %s1932_s19 = smov 115   ;;  %s1933_s1 = smov 113   ;;  %v1944_v16 = vmov 0.0|0.0   ;;  %vm1947_vm0 = vmmov 0   ;;  %v614_v51 = vld [vmem:[%s2341_s0] sm:$0x3] }
   0x4   :  { %v1980_v9 = vsub.s32 0, %v25_v3  ;;  %s1934_s20 = smov 117   ;;  %s1935_s21 = smov 116   ;;  %1832 = vmatprep.subr.bf16.mxu0 %v1944_v16  ;;  %1835 = vmatprep.subr.bf16.mxu1 %v1944_v16  ;;  %v1948_v23 = vmov 0.0   ;;  %vm125_vm1 = vcmask 122880   ;;  %vm638_vm2 = vcmask 130048  }
   0x5   :  { %v26_v6 = vsub.s32 %v23_v4, %v25_v3  ;;  %s1936_s22 = smov 119   ;;  %s1937_s23 = smov 118   ;;  %1770 = vmatprep.mubr.msk.f32.mxu0 %vm1947_vm0, %v1948_v23  ;;  %1777 = vmatprep.mubr.msk.f32.mxu1 %vm1947_vm0, %v1948_v23  ;;  %vm1486_vm3 = vcmask 1041409   ;;  %vm1489_vm4 = vcmask 1042434   ;;  %vm1492_vm5 = vcmask 1043459  }
   0x6   :  { %s1938_s24 = smov 121   ;;  %s1939_s25 = smov 120   ;;  %vm1507_vm6 = vcmask 64512   ;;  %vm1495_vm7 = vcmask 1044484   ;;  %vm1498_vm8 = vcmask 1045509   ;;  %vm1501_vm9 = vcmask 1046534  }
   0x7   :  { %v27_v8 = vrot.slane %v18_v5, %v26_v6  ;;  %v34_v10 = vrot.slane %v20_v7, %v26_v6  ;;  %s1940_s26 = smov 123   ;;  %s1941_s27 = smov 122   ;;  %vm1504_vm10 = vcmask 1047559   ;;  %vm1698_vm11 = vcmask 261248  }
   0x8   :  { %s1942_s28 = smov 125   ;;  %s1943_s29 = smov 124  }
   0x9   :  { %v43_v11 = vrot.slane %v27_v8, %v26_v6  ;;  %v1982_v12 = vrot.slane %v34_v10, %v26_v6  ;;  %v35_v14 = vcombine.high %v27_v8, %v27_v8  ;;  %v36_v17 = vcombine.high %v34_v10, %v34_v10  ;;  %s1945_s30 = smov 127   ;;  %s1946_s5 = smov 126   ;;  %v615_v10 = vld [vmem:[%s2341_s0 + $0x2] sm:$0x3] }
   0xb   :  { %v72_v13 = vrot.slane %v43_v11, %v1980_v9  ;;  %v57_v15 = vrot.slane %v35_v14, %v26_v6  ;;  %v2004_v19 = vrot.slane %v36_v17, %v26_v6  ;;  %v65_v20 = vcombine.high %v43_v11, %v43_v11 }
   0xc   :  { %v88_v31 = vrot.slane %v1982_v12, %v1980_v9  ;;  %v66_v6 = vcombine.high %v1982_v12, %v1982_v12 }
   0xd   :  { %166 = vrot.lane.b32.xlu1 %v72_v13, %s1930_s17  ;;  %101 = vrot.lane.b32.xlu0 %v72_v13, %s1931_s18  ;;  %v76_v18 = vrot.slane %v57_v15, %v1980_v9  ;;  %v80_v21 = vrot.slane %v65_v20, %v1980_v9  ;;  %v67_v22 = vcombine.high %v57_v15, %v57_v15 }
   0xe   :  { %v92_v52 = vrot.slane %v2004_v19, %v1980_v9  ;;  %v96_v11 = vrot.slane %v66_v6, %v1980_v9 }
   0xf   :  { %v84_v24 = vrot.slane %v67_v22, %v1980_v9 }
  0x11   :  { %198 = vrot.lane.b32.xlu1 %v72_v13, %s1932_s19  ;;  %134 = vrot.lane.b32.xlu0 %v72_v13, %s1933_s1 }
  0x15   :  { %262 = vrot.lane.b32.xlu1 %v72_v13, %s1934_s20  ;;  %230 = vrot.lane.b32.xlu0 %v72_v13, %s1935_s21 }
  0x19   :  { %326 = vrot.lane.b32.xlu1 %v72_v13, %s1936_s22  ;;  %294 = vrot.lane.b32.xlu0 %v72_v13, %s1937_s23 }
  0x1d   :  { %390 = vrot.lane.b32.xlu1 %v72_v13, %s1938_s24  ;;  %358 = vrot.lane.b32.xlu0 %v72_v13, %s1939_s25 }
  0x21   :  { %454 = vrot.lane.b32.xlu1 %v72_v13, %s1940_s26  ;;  %422 = vrot.lane.b32.xlu0 %v72_v13, %s1941_s27 }
  0x25   :  { %518 = vrot.lane.b32.xlu1 %v72_v13, %s1942_s28  ;;  %486 = vrot.lane.b32.xlu0 %v72_v13, %s1943_s29 }
  0x29   :  { %582 = vrot.lane.b32.xlu1 %v72_v13, %s1945_s30  ;;  %550 = vrot.lane.b32.xlu0 %v72_v13, %s1946_s5 }
  0x2d   :  { %136 = vrot.lane.b32.xlu1 %v76_v18, %s1933_s1  ;;  %103 = vrot.lane.b32.xlu0 %v76_v18, %s1931_s18 }
  0x31   :  { %200 = vrot.lane.b32.xlu1 %v76_v18, %s1932_s19  ;;  %168 = vrot.lane.b32.xlu0 %v76_v18, %s1930_s17 }
  0x35   :  { %264 = vrot.lane.b32.xlu1 %v76_v18, %s1934_s20  ;;  %232 = vrot.lane.b32.xlu0 %v76_v18, %s1935_s21 }
  0x39   :  { %328 = vrot.lane.b32.xlu1 %v76_v18, %s1936_s22  ;;  %296 = vrot.lane.b32.xlu0 %v76_v18, %s1937_s23 }
  0x3d   :  { %392 = vrot.lane.b32.xlu1 %v76_v18, %s1938_s24  ;;  %360 = vrot.lane.b32.xlu0 %v76_v18, %s1939_s25 }
  0x41   :  { %456 = vrot.lane.b32.xlu1 %v76_v18, %s1940_s26  ;;  %424 = vrot.lane.b32.xlu0 %v76_v18, %s1941_s27 }
  0x45   :  { %520 = vrot.lane.b32.xlu1 %v76_v18, %s1942_s28  ;;  %488 = vrot.lane.b32.xlu0 %v76_v18, %s1943_s29 }
  0x49   :  { %584 = vrot.lane.b32.xlu1 %v76_v18, %s1945_s30  ;;  %552 = vrot.lane.b32.xlu0 %v76_v18, %s1946_s5 }
  0x4d   :  { %138 = vrot.lane.b32.xlu1 %v80_v21, %s1933_s1  ;;  %105 = vrot.lane.b32.xlu0 %v80_v21, %s1931_s18 }
  0x51   :  { %202 = vrot.lane.b32.xlu1 %v80_v21, %s1932_s19  ;;  %170 = vrot.lane.b32.xlu0 %v80_v21, %s1930_s17 }
  0x55   :  { %266 = vrot.lane.b32.xlu1 %v80_v21, %s1934_s20  ;;  %234 = vrot.lane.b32.xlu0 %v80_v21, %s1935_s21 }
  0x59   :  { %330 = vrot.lane.b32.xlu1 %v80_v21, %s1936_s22  ;;  %298 = vrot.lane.b32.xlu0 %v80_v21, %s1937_s23 }
  0x5d   :  { %394 = vrot.lane.b32.xlu1 %v80_v21, %s1938_s24  ;;  %362 = vrot.lane.b32.xlu0 %v80_v21, %s1939_s25 }
  0x61   :  { %458 = vrot.lane.b32.xlu1 %v80_v21, %s1940_s26  ;;  %426 = vrot.lane.b32.xlu0 %v80_v21, %s1941_s27 }
  0x65   :  { %522 = vrot.lane.b32.xlu1 %v80_v21, %s1942_s28  ;;  %490 = vrot.lane.b32.xlu0 %v80_v21, %s1943_s29 }
  0x69   :  { %586 = vrot.lane.b32.xlu1 %v80_v21, %s1945_s30  ;;  %554 = vrot.lane.b32.xlu0 %v80_v21, %s1946_s5 }
  0x6d   :  { %140 = vrot.lane.b32.xlu1 %v84_v24, %s1933_s1  ;;  %107 = vrot.lane.b32.xlu0 %v84_v24, %s1931_s18 }
  0x71   :  { %204 = vrot.lane.b32.xlu1 %v84_v24, %s1932_s19  ;;  %172 = vrot.lane.b32.xlu0 %v84_v24, %s1930_s17 }
  0x75   :  { %268 = vrot.lane.b32.xlu1 %v84_v24, %s1934_s20  ;;  %236 = vrot.lane.b32.xlu0 %v84_v24, %s1935_s21 }
  0x79   :  { %332 = vrot.lane.b32.xlu1 %v84_v24, %s1936_s22  ;;  %300 = vrot.lane.b32.xlu0 %v84_v24, %s1937_s23 }
  0x7d   :  { %396 = vrot.lane.b32.xlu1 %v84_v24, %s1938_s24  ;;  %364 = vrot.lane.b32.xlu0 %v84_v24, %s1939_s25 }
  0x7f   :  { %v167_v25 = vpop.permute.xlu1 %166  ;;  %v102_v26 = vpop.permute.xlu0 %101 }
  0x80   :  { %190 = vst.msk [vmem:[#allocation2 + $0x2] sm:$0x1] %vm125_vm1, %v167_v25  ;;  %126 = vst.msk [vmem:[#allocation2] sm:$0x1] %vm125_vm1, %v102_v26 }
  0x81   :  { %460 = vrot.lane.b32.xlu1 %v84_v24, %s1940_s26  ;;  %428 = vrot.lane.b32.xlu0 %v84_v24, %s1941_s27 }
  0x83   :  { %v199_v27 = vpop.permute.xlu1 %198  ;;  %v135_v28 = vpop.permute.xlu0 %134 }
  0x84   :  { %222 = vst.msk [vmem:[#allocation2 + $0x3] sm:$0x1] %vm125_vm1, %v199_v27  ;;  %158 = vst.msk [vmem:[#allocation2 + $0x1] sm:$0x1] %vm125_vm1, %v135_v28 }
  0x85   :  { %524 = vrot.lane.b32.xlu1 %v84_v24, %s1942_s28  ;;  %492 = vrot.lane.b32.xlu0 %v84_v24, %s1943_s29 }
  0x87   :  { %v263_v29 = vpop.permute.xlu1 %262  ;;  %v231_v30 = vpop.permute.xlu0 %230 }
  0x88   :  { %286 = vst.msk [vmem:[#allocation2 + $0x5] sm:$0x1] %vm125_vm1, %v263_v29  ;;  %254 = vst.msk [vmem:[#allocation2 + $0x4] sm:$0x1] %vm125_vm1, %v231_v30 }
  0x89   :  { %588 = vrot.lane.b32.xlu1 %v84_v24, %s1945_s30  ;;  %556 = vrot.lane.b32.xlu0 %v84_v24, %s1946_s5 }
  0x8b   :  { %v327_v32 = vpop.permute.xlu1 %326  ;;  %v295_v33 = vpop.permute.xlu0 %294 }
  0x8c   :  { %350 = vst.msk [vmem:[#allocation2 + $0x7] sm:$0x1] %vm125_vm1, %v327_v32  ;;  %318 = vst.msk [vmem:[#allocation2 + $0x6] sm:$0x1] %vm125_vm1, %v295_v33  ;;  %v68_v32 = vcombine.high %v2004_v19, %v2004_v19 }
  0x8d   :  { %142 = vrot.lane.b32.xlu1 %v88_v31, %s1933_s1  ;;  %109 = vrot.lane.b32.xlu0 %v88_v31, %s1931_s18 }
  0x8f   :  { %v391_v34 = vpop.permute.xlu1 %390  ;;  %v359_v35 = vpop.permute.xlu0 %358 }
  0x90   :  { %414 = vst.msk [vmem:[#allocation2 + $0x9] sm:$0x1] %vm125_vm1, %v391_v34  ;;  %382 = vst.msk [vmem:[#allocation2 + $0x8] sm:$0x1] %vm125_vm1, %v359_v35  ;;  %v616_v35 = vld [vmem:[%s2341_s0 + $0x4] sm:$0x3] }
  0x91   :  { %206 = vrot.lane.b32.xlu1 %v88_v31, %s1932_s19  ;;  %174 = vrot.lane.b32.xlu0 %v88_v31, %s1930_s17 }
  0x93   :  { %v455_v36 = vpop.permute.xlu1 %454  ;;  %v423_v37 = vpop.permute.xlu0 %422  ;;  %v622_v46 = vld [vmem:[#allocation2] sm:$0xff] }
  0x94   :  { %478 = vst.msk [vmem:[#allocation2 + $0xb] sm:$0x1] %vm125_vm1, %v455_v36  ;;  %446 = vst.msk [vmem:[#allocation2 + $0xa] sm:$0x1] %vm125_vm1, %v423_v37  ;;  %v100_v36 = vrot.slane %v68_v32, %v1980_v9  ;;  %v619_v32 = vld [vmem:[%s2341_s0 + $0xa] sm:$0x3] }
  0x95   :  { %270 = vrot.lane.b32.xlu1 %v88_v31, %s1934_s20  ;;  %238 = vrot.lane.b32.xlu0 %v88_v31, %s1935_s21 }
  0x97   :  { %v519_v38 = vpop.permute.xlu1 %518  ;;  %v487_v39 = vpop.permute.xlu0 %486 }
  0x98   :  { %542 = vst.msk [vmem:[#allocation2 + $0xd] sm:$0x1] %vm125_vm1, %v519_v38  ;;  %510 = vst.msk [vmem:[#allocation2 + $0xc] sm:$0x1] %vm125_vm1, %v487_v39 }
  0x99   :  { %334 = vrot.lane.b32.xlu1 %v88_v31, %s1936_s22  ;;  %302 = vrot.lane.b32.xlu0 %v88_v31, %s1937_s23 }
  0x9b   :  { %v583_v40 = vpop.permute.xlu1 %582  ;;  %v551_v41 = vpop.permute.xlu0 %550 }
  0x9c   :  { %606 = vst.msk [vmem:[#allocation2 + $0xf] sm:$0x1] %vm125_vm1, %v583_v40  ;;  %574 = vst.msk [vmem:[#allocation2 + $0xe] sm:$0x1] %vm125_vm1, %v551_v41 }
  0x9d   :  { %398 = vrot.lane.b32.xlu1 %v88_v31, %s1938_s24  ;;  %366 = vrot.lane.b32.xlu0 %v88_v31, %s1939_s25 }
  0x9f   :  { %v137_v42 = vpop.permute.xlu1 %136  ;;  %v104_v43 = vpop.permute.xlu0 %103 }
  0xa0   :  { %159 = vst.msk [vmem:[#allocation2 + $0x11] sm:$0x1] %vm125_vm1, %v137_v42  ;;  %127 = vst.msk [vmem:[#allocation2 + $0x10] sm:$0x1] %vm125_vm1, %v104_v43 }
  0xa1   :  { %462 = vrot.lane.b32.xlu1 %v88_v31, %s1940_s26  ;;  %430 = vrot.lane.b32.xlu0 %v88_v31, %s1941_s27 }
  0xa3   :  { %v201_v44 = vpop.permute.xlu1 %200  ;;  %v169_v45 = vpop.permute.xlu0 %168  ;;  %v623_v47 = vld [vmem:[#allocation2 + $0x8] sm:$0xff] }
  0xa4   :  { %223 = vst.msk [vmem:[#allocation2 + $0x13] sm:$0x1] %vm125_vm1, %v201_v44  ;;  %191 = vst.msk [vmem:[#allocation2 + $0x12] sm:$0x1] %vm125_vm1, %v169_v45  ;;  %v1833_v48 = vpack.c.bf16 %v623_v47, %v622_v46 }
  0xa5   :  { %526 = vrot.lane.b32.xlu1 %v88_v31, %s1942_s28  ;;  %494 = vrot.lane.b32.xlu0 %v88_v31, %s1943_s29 }
  0xa6   :  { %1834 = vmatpush3.bf16.msra.mxu0 %v1833_v48 }
  0xa7   :  { %v265_v49 = vpop.permute.xlu1 %264  ;;  %v233_v50 = vpop.permute.xlu0 %232  ;;  %1838 = vmatprep.subr.bf16.mxu0 %v1944_v16 }
  0xa8   :  { %287 = vst.msk [vmem:[#allocation2 + $0x15] sm:$0x1] %vm125_vm1, %v265_v49  ;;  %255 = vst.msk [vmem:[#allocation2 + $0x14] sm:$0x1] %vm125_vm1, %v233_v50 }
  0xa9   :  { %590 = vrot.lane.b32.xlu1 %v88_v31, %s1945_s30  ;;  %558 = vrot.lane.b32.xlu0 %v88_v31, %s1946_s5 }
  0xaa   :  { %1771 = vmatmul.mubr.msk.f32.vlgmr.msra.gmra.mrb[0].mxu0 %vm638_vm2, %v614_v51 }
  0xab   :  { %v329_v53 = vpop.permute.xlu1 %328  ;;  %v297_v54 = vpop.permute.xlu0 %296  ;;  %1784 = vmatprep.mubr.msk.f32.mxu0 %vm1947_vm0, %v1948_v23 }
  0xac   :  { %351 = vst.msk [vmem:[#allocation2 + $0x17] sm:$0x1] %vm125_vm1, %v329_v53  ;;  %319 = vst.msk [vmem:[#allocation2 + $0x16] sm:$0x1] %vm125_vm1, %v297_v54  ;;  %v617_v54 = vld [vmem:[%s2341_s0 + $0x6] sm:$0x3] }
  0xad   :  { %144 = vrot.lane.b32.xlu1 %v92_v52, %s1933_s1  ;;  %111 = vrot.lane.b32.xlu0 %v92_v52, %s1931_s18 }
  0xaf   :  { %v393_v55 = vpop.permute.xlu1 %392  ;;  %v361_v56 = vpop.permute.xlu0 %360 }
  0xb0   :  { %415 = vst.msk [vmem:[#allocation2 + $0x19] sm:$0x1] %vm125_vm1, %v393_v55  ;;  %383 = vst.msk [vmem:[#allocation2 + $0x18] sm:$0x1] %vm125_vm1, %v361_v56 }
  0xb1   :  { %208 = vrot.lane.b32.xlu1 %v92_v52, %s1932_s19  ;;  %176 = vrot.lane.b32.xlu0 %v92_v52, %s1930_s17 }
  0xb3   :  { %v457_v57 = vpop.permute.xlu1 %456  ;;  %v425_v58 = vpop.permute.xlu0 %424  ;;  %v624_v3 = vld [vmem:[#allocation2 + $0x10] sm:$0xff] }
  0xb4   :  { %479 = vst.msk [vmem:[#allocation2 + $0x1b] sm:$0x1] %vm125_vm1, %v457_v57  ;;  %447 = vst.msk [vmem:[#allocation2 + $0x1a] sm:$0x1] %vm125_vm1, %v425_v58 }
  0xb5   :  { %272 = vrot.lane.b32.xlu1 %v92_v52, %s1934_s20  ;;  %240 = vrot.lane.b32.xlu0 %v92_v52, %s1935_s21 }
  0xb7   :  { %v521_v59 = vpop.permute.xlu1 %520  ;;  %v489_v60 = vpop.permute.xlu0 %488 }
  0xb8   :  { %543 = vst.msk [vmem:[#allocation2 + $0x1d] sm:$0x1] %vm125_vm1, %v521_v59  ;;  %511 = vst.msk [vmem:[#allocation2 + $0x1c] sm:$0x1] %vm125_vm1, %v489_v60 }
  0xb9   :  { %336 = vrot.lane.b32.xlu1 %v92_v52, %s1936_s22  ;;  %304 = vrot.lane.b32.xlu0 %v92_v52, %s1937_s23 }
  0xbb   :  { %v585_v61 = vpop.permute.xlu1 %584  ;;  %v553_v62 = vpop.permute.xlu0 %552 }
  0xbc   :  { %607 = vst.msk [vmem:[#allocation2 + $0x1f] sm:$0x1] %vm125_vm1, %v585_v61  ;;  %575 = vst.msk [vmem:[#allocation2 + $0x1e] sm:$0x1] %vm125_vm1, %v553_v62 }
  0xbd   :  { %400 = vrot.lane.b32.xlu1 %v92_v52, %s1938_s24  ;;  %368 = vrot.lane.b32.xlu0 %v92_v52, %s1939_s25 }
  0xbf   :  { %v139_v63 = vpop.permute.xlu1 %138  ;;  %v106_v0 = vpop.permute.xlu0 %105 }
  0xc0   :  { %160 = vst.msk [vmem:[#allocation2 + $0x21] sm:$0x1] %vm125_vm1, %v139_v63  ;;  %128 = vst.msk [vmem:[#allocation2 + $0x20] sm:$0x1] %vm125_vm1, %v106_v0 }
  0xc1   :  { %464 = vrot.lane.b32.xlu1 %v92_v52, %s1940_s26  ;;  %432 = vrot.lane.b32.xlu0 %v92_v52, %s1941_s27 }
  0xc3   :  { %v203_v1 = vpop.permute.xlu1 %202  ;;  %v171_v2 = vpop.permute.xlu0 %170  ;;  %v625_v4 = vld [vmem:[#allocation2 + $0x18] sm:$0xff] }
  0xc4   :  { %224 = vst.msk [vmem:[#allocation2 + $0x23] sm:$0x1] %vm125_vm1, %v203_v1  ;;  %192 = vst.msk [vmem:[#allocation2 + $0x22] sm:$0x1] %vm125_vm1, %v171_v2  ;;  %v1836_v5 = vpack.c.bf16 %v625_v4, %v624_v3 }
  0xc5   :  { %528 = vrot.lane.b32.xlu1 %v92_v52, %s1942_s28  ;;  %496 = vrot.lane.b32.xlu0 %v92_v52, %s1943_s29 }
  0xc6   :  { %1837 = vmatpush3.bf16.msra.mxu1 %v1836_v5 }
  0xc7   :  { %v267_v7 = vpop.permute.xlu1 %266  ;;  %v235_v8 = vpop.permute.xlu0 %234  ;;  %1841 = vmatprep.subr.bf16.mxu1 %v1944_v16 }
  0xc8   :  { %288 = vst.msk [vmem:[#allocation2 + $0x25] sm:$0x1] %vm125_vm1, %v267_v7  ;;  %256 = vst.msk [vmem:[#allocation2 + $0x24] sm:$0x1] %vm125_vm1, %v235_v8  ;;  %v618_v8 = vld [vmem:[%s2341_s0 + $0x8] sm:$0x3] }
  0xc9   :  { %592 = vrot.lane.b32.xlu1 %v92_v52, %s1945_s30  ;;  %560 = vrot.lane.b32.xlu0 %v92_v52, %s1946_s5 }
  0xca   :  { %1778 = vmatmul.mubr.msk.f32.vlgmr.msra.gmra.mrb[0].mxu1 %vm638_vm2, %v615_v10 }
  0xcb   :  { %v331_v12 = vpop.permute.xlu1 %330  ;;  %v299_v13 = vpop.permute.xlu0 %298  ;;  %1791 = vmatprep.mubr.msk.f32.mxu1 %vm1947_vm0, %v1948_v23 }
  0xcc   :  { %352 = vst.msk [vmem:[#allocation2 + $0x27] sm:$0x1] %vm125_vm1, %v331_v12  ;;  %320 = vst.msk [vmem:[#allocation2 + $0x26] sm:$0x1] %vm125_vm1, %v299_v13 }
  0xcd   :  { %146 = vrot.lane.b32.xlu1 %v96_v11, %s1933_s1  ;;  %113 = vrot.lane.b32.xlu0 %v96_v11, %s1931_s18 }
  0xcf   :  { %v395_v14 = vpop.permute.xlu1 %394  ;;  %v363_v15 = vpop.permute.xlu0 %362 }
  0xd0   :  { %416 = vst.msk [vmem:[#allocation2 + $0x29] sm:$0x1] %vm125_vm1, %v395_v14  ;;  %384 = vst.msk [vmem:[#allocation2 + $0x28] sm:$0x1] %vm125_vm1, %v363_v15 }
  0xd1   :  { %210 = vrot.lane.b32.xlu1 %v96_v11, %s1932_s19  ;;  %178 = vrot.lane.b32.xlu0 %v96_v11, %s1930_s17 }
  0xd3   :  { %v459_v17 = vpop.permute.xlu1 %458  ;;  %v427_v18 = vpop.permute.xlu0 %426  ;;  %v626_v29 = vld [vmem:[#allocation2 + $0x20] sm:$0xff] }
  0xd4   :  { %480 = vst.msk [vmem:[#allocation2 + $0x2b] sm:$0x1] %vm125_vm1, %v459_v17  ;;  %448 = vst.msk [vmem:[#allocation2 + $0x2a] sm:$0x1] %vm125_vm1, %v427_v18 }
  0xd5   :  { %274 = vrot.lane.b32.xlu1 %v96_v11, %s1934_s20  ;;  %242 = vrot.lane.b32.xlu0 %v96_v11, %s1935_s21 }
  0xd7   :  { %v523_v20 = vpop.permute.xlu1 %522  ;;  %v491_v21 = vpop.permute.xlu0 %490 }
  0xd8   :  { %544 = vst.msk [vmem:[#allocation2 + $0x2d] sm:$0x1] %vm125_vm1, %v523_v20  ;;  %512 = vst.msk [vmem:[#allocation2 + $0x2c] sm:$0x1] %vm125_vm1, %v491_v21 }
  0xd9   :  { %338 = vrot.lane.b32.xlu1 %v96_v11, %s1936_s22  ;;  %306 = vrot.lane.b32.xlu0 %v96_v11, %s1937_s23 }
  0xdb   :  { %v587_v22 = vpop.permute.xlu1 %586  ;;  %v555_v24 = vpop.permute.xlu0 %554 }
  0xdc   :  { %608 = vst.msk [vmem:[#allocation2 + $0x2f] sm:$0x1] %vm125_vm1, %v587_v22  ;;  %576 = vst.msk [vmem:[#allocation2 + $0x2e] sm:$0x1] %vm125_vm1, %v555_v24 }
  0xdd   :  { %402 = vrot.lane.b32.xlu1 %v96_v11, %s1938_s24  ;;  %370 = vrot.lane.b32.xlu0 %v96_v11, %s1939_s25 }
  0xdf   :  { %v141_v25 = vpop.permute.xlu1 %140  ;;  %v108_v26 = vpop.permute.xlu0 %107 }
  0xe0   :  { %161 = vst.msk [vmem:[#allocation2 + $0x31] sm:$0x1] %vm125_vm1, %v141_v25  ;;  %129 = vst.msk [vmem:[#allocation2 + $0x30] sm:$0x1] %vm125_vm1, %v108_v26 }
  0xe1   :  { %466 = vrot.lane.b32.xlu1 %v96_v11, %s1940_s26  ;;  %434 = vrot.lane.b32.xlu0 %v96_v11, %s1941_s27 }
  0xe3   :  { %v205_v27 = vpop.permute.xlu1 %204  ;;  %v173_v28 = vpop.permute.xlu0 %172  ;;  %v627_v30 = vld [vmem:[#allocation2 + $0x28] sm:$0xff] }
  0xe4   :  { %225 = vst.msk [vmem:[#allocation2 + $0x33] sm:$0x1] %vm125_vm1, %v205_v27  ;;  %193 = vst.msk [vmem:[#allocation2 + $0x32] sm:$0x1] %vm125_vm1, %v173_v28  ;;  %v1839_v31 = vpack.c.bf16 %v627_v30, %v626_v29 }
  0xe5   :  { %530 = vrot.lane.b32.xlu1 %v96_v11, %s1942_s28  ;;  %498 = vrot.lane.b32.xlu0 %v96_v11, %s1943_s29 }
  0xe6   :  { %1840 = vmatpush3.bf16.msra.mxu0 %v1839_v31 }
  0xe7   :  { %v269_v33 = vpop.permute.xlu1 %268  ;;  %v237_v34 = vpop.permute.xlu0 %236  ;;  %1844 = vmatprep.subr.bf16.mxu0 %v1944_v16 }
  0xe8   :  { %289 = vst.msk [vmem:[#allocation2 + $0x35] sm:$0x1] %vm125_vm1, %v269_v33  ;;  %257 = vst.msk [vmem:[#allocation2 + $0x34] sm:$0x1] %vm125_vm1, %v237_v34 }
  0xe9   :  { %594 = vrot.lane.b32.xlu1 %v96_v11, %s1945_s30  ;;  %562 = vrot.lane.b32.xlu0 %v96_v11, %s1946_s5 }
  0xea   :  { %1785 = vmatmul.mubr.msk.f32.vlgmr.msra.gmra.mrb[2].mxu0 %vm638_vm2, %v616_v35 }
  0xeb   :  { %v333_v19 = vpop.permute.xlu1 %332  ;;  %v301_v37 = vpop.permute.xlu0 %300  ;;  %1798 = vmatprep.mubr.msk.f32.mxu0 %vm1947_vm0, %v1948_v23 }
  0xec   :  { %353 = vst.msk [vmem:[#allocation2 + $0x37] sm:$0x1] %vm125_vm1, %v333_v19  ;;  %321 = vst.msk [vmem:[#allocation2 + $0x36] sm:$0x1] %vm125_vm1, %v301_v37 }
  0xed   :  { %148 = vrot.lane.b32.xlu1 %v100_v36, %s1933_s1  ;;  %115 = vrot.lane.b32.xlu0 %v100_v36, %s1931_s18 }
  0xef   :  { %v397_v38 = vpop.permute.xlu1 %396  ;;  %v365_v39 = vpop.permute.xlu0 %364 }
  0xf0   :  { %417 = vst.msk [vmem:[#allocation2 + $0x39] sm:$0x1] %vm125_vm1, %v397_v38  ;;  %385 = vst.msk [vmem:[#allocation2 + $0x38] sm:$0x1] %vm125_vm1, %v365_v39 }
  0xf1   :  { %212 = vrot.lane.b32.xlu1 %v100_v36, %s1932_s19  ;;  %180 = vrot.lane.b32.xlu0 %v100_v36, %s1930_s17 }
  0xf3   :  { %v461_v9 = vpop.permute.xlu1 %460  ;;  %v429_v40 = vpop.permute.xlu0 %428  ;;  %v628_v49 = vld [vmem:[#allocation2 + $0x30] sm:$0xff] }
  0xf4   :  { %481 = vst.msk [vmem:[#allocation2 + $0x3b] sm:$0x1] %vm125_vm1, %v461_v9  ;;  %449 = vst.msk [vmem:[#allocation2 + $0x3a] sm:$0x1] %vm125_vm1, %v429_v40 }
  0xf5   :  { %276 = vrot.lane.b32.xlu1 %v100_v36, %s1934_s20  ;;  %244 = vrot.lane.b32.xlu0 %v100_v36, %s1935_s21 }
  0xf7   :  { %v525_v41 = vpop.permute.xlu1 %524  ;;  %v493_v42 = vpop.permute.xlu0 %492 }
  0xf8   :  { %545 = vst.msk [vmem:[#allocation2 + $0x3d] sm:$0x1] %vm125_vm1, %v525_v41  ;;  %513 = vst.msk [vmem:[#allocation2 + $0x3c] sm:$0x1] %vm125_vm1, %v493_v42 }
  0xf9   :  { %340 = vrot.lane.b32.xlu1 %v100_v36, %s1936_s22  ;;  %308 = vrot.lane.b32.xlu0 %v100_v36, %s1937_s23 }
  0xfb   :  { %v589_v43 = vpop.permute.xlu1 %588  ;;  %v557_v44 = vpop.permute.xlu0 %556 }
  0xfc   :  { %609 = vst.msk [vmem:[#allocation2 + $0x3f] sm:$0x1] %vm125_vm1, %v589_v43  ;;  %577 = vst.msk [vmem:[#allocation2 + $0x3e] sm:$0x1] %vm125_vm1, %v557_v44 }
  0xfd   :  { %404 = vrot.lane.b32.xlu1 %v100_v36, %s1938_s24  ;;  %372 = vrot.lane.b32.xlu0 %v100_v36, %s1939_s25 }
  0xff   :  { %v143_v45 = vpop.permute.xlu1 %142  ;;  %v110_v46 = vpop.permute.xlu0 %109 }
 0x100   :  { %162 = vst.msk [vmem:[#allocation2 + $0x41] sm:$0x1] %vm125_vm1, %v143_v45  ;;  %130 = vst.msk [vmem:[#allocation2 + $0x40] sm:$0x1] %vm125_vm1, %v110_v46 }
 0x101   :  { %468 = vrot.lane.b32.xlu1 %v100_v36, %s1940_s26  ;;  %436 = vrot.lane.b32.xlu0 %v100_v36, %s1941_s27  ;;  %s1951_s27 = smov [#allocation3]  }
 0x103   :  { %v207_v47 = vpop.permute.xlu1 %206  ;;  %v175_v48 = vpop.permute.xlu0 %174  ;;  %v629_v50 = vld [vmem:[#allocation2 + $0x38] sm:$0xff] }
 0x104   :  { %226 = vst.msk [vmem:[#allocation2 + $0x43] sm:$0x1] %vm125_vm1, %v207_v47  ;;  %194 = vst.msk [vmem:[#allocation2 + $0x42] sm:$0x1] %vm125_vm1, %v175_v48  ;;  %v1842_v51 = vpack.c.bf16 %v629_v50, %v628_v49  ;;  %v620_v48 = vld [vmem:[%s2341_s0 + $0xc] sm:$0x3] }
 0x105   :  { %532 = vrot.lane.b32.xlu1 %v100_v36, %s1942_s28  ;;  %500 = vrot.lane.b32.xlu0 %v100_v36, %s1943_s29  ;;  %s1706_s28 = sshll.u32 %s1951_s27, 4  ;;  %s1707_s28 = int_to_ptr.vmem [resolvable:$true] %s1706_s28 }
 0x106   :  { %1843 = vmatpush3.bf16.msra.mxu1 %v1842_v51  ;;  %s1905_s29 = scalar_lea.vmem %s1707_s28, 128  ;;  %p1910_p1 = scmp.lt.s32.totalorder %s1707_s28, %s1707_s28 }
 0x107   :  { %v271_v52 = vpop.permute.xlu1 %270  ;;  %v239_v53 = vpop.permute.xlu0 %238  ;;  %1847 = vmatprep.subr.bf16.mxu1 %v1944_v16  ;;  %p1906_p0 = scmp.ne.s32.totalorder %s1707_s28, %s1905_s29  ;;  %p1911_p2 = scmp.lt.s32.totalorder %s1905_s29, %s1905_s29 }
 0x108   :  { %290 = vst.msk [vmem:[#allocation2 + $0x45] sm:$0x1] %vm125_vm1, %v271_v52  ;;  %258 = vst.msk [vmem:[#allocation2 + $0x44] sm:$0x1] %vm125_vm1, %v239_v53 }
 0x109   :  { %596 = vrot.lane.b32.xlu1 %v100_v36, %s1945_s30  ;;  %564 = vrot.lane.b32.xlu0 %v100_v36, %s1946_s5  ;;  %p1912_p3 = por %p1911_p2, %p1910_p1 }
 0x10a   :  { %1792 = vmatmul.mubr.msk.f32.vlgmr.msra.gmra.mrb[2].mxu1 %vm638_vm2, %v617_v54 }
 0x10b   :  { %v335_v55 = vpop.permute.xlu1 %334  ;;  %v303_v56 = vpop.permute.xlu0 %302  ;;  %1805 = vmatprep.mubr.msk.f32.mxu1 %vm1947_vm0, %v1948_v23  ;;  %p1913_p4 = pnand %p1912_p3, %p1906_p0 }
 0x10c   :  { %354 = vst.msk [vmem:[#allocation2 + $0x47] sm:$0x1] %vm125_vm1, %v335_v55  ;;  %322 = vst.msk [vmem:[#allocation2 + $0x46] sm:$0x1] %vm125_vm1, %v303_v56 }
 0x10f   :  { %v399_v57 = vpop.permute.xlu1 %398  ;;  %v367_v58 = vpop.permute.xlu0 %366 }
 0x110   :  { %418 = vst.msk [vmem:[#allocation2 + $0x49] sm:$0x1] %vm125_vm1, %v399_v57  ;;  %386 = vst.msk [vmem:[#allocation2 + $0x48] sm:$0x1] %vm125_vm1, %v367_v58 }
 0x113   :  { %v463_v59 = vpop.permute.xlu1 %462  ;;  %v431_v60 = vpop.permute.xlu0 %430  ;;  %v630_v5 = vld [vmem:[#allocation2 + $0x40] sm:$0xff] }
 0x114   :  { %482 = vst.msk [vmem:[#allocation2 + $0x4b] sm:$0x1] %vm125_vm1, %v463_v59  ;;  %450 = vst.msk [vmem:[#allocation2 + $0x4a] sm:$0x1] %vm125_vm1, %v431_v60 }
 0x117   :  { %v527_v61 = vpop.permute.xlu1 %526  ;;  %v495_v62 = vpop.permute.xlu0 %494 }
 0x118   :  { %546 = vst.msk [vmem:[#allocation2 + $0x4d] sm:$0x1] %vm125_vm1, %v527_v61  ;;  %514 = vst.msk [vmem:[#allocation2 + $0x4c] sm:$0x1] %vm125_vm1, %v495_v62 }
 0x11b   :  { %v591_v63 = vpop.permute.xlu1 %590  ;;  %v559_v0 = vpop.permute.xlu0 %558 }
 0x11c   :  { %610 = vst.msk [vmem:[#allocation2 + $0x4f] sm:$0x1] %vm125_vm1, %v591_v63  ;;  %578 = vst.msk [vmem:[#allocation2 + $0x4e] sm:$0x1] %vm125_vm1, %v559_v0 }
 0x11f   :  { %v145_v1 = vpop.permute.xlu1 %144  ;;  %v112_v2 = vpop.permute.xlu0 %111 }
 0x120   :  { %163 = vst.msk [vmem:[#allocation2 + $0x51] sm:$0x1] %vm125_vm1, %v145_v1  ;;  %131 = vst.msk [vmem:[#allocation2 + $0x50] sm:$0x1] %vm125_vm1, %v112_v2 }
 0x123   :  { %v209_v3 = vpop.permute.xlu1 %208  ;;  %v177_v4 = vpop.permute.xlu0 %176  ;;  %v631_v6 = vld [vmem:[#allocation2 + $0x48] sm:$0xff] }
 0x124   :  { %227 = vst.msk [vmem:[#allocation2 + $0x53] sm:$0x1] %vm125_vm1, %v209_v3  ;;  %195 = vst.msk [vmem:[#allocation2 + $0x52] sm:$0x1] %vm125_vm1, %v177_v4  ;;  %v1845_v7 = vpack.c.bf16 %v631_v6, %v630_v5  ;;  %v621_v6 = vld [vmem:[%s2341_s0 + $0xe] sm:$0x3] }
 0x126   :  { %1846 = vmatpush3.bf16.msra.mxu0 %v1845_v7 }
 0x127   :  { %v273_v10 = vpop.permute.xlu1 %272  ;;  %v241_v11 = vpop.permute.xlu0 %240  ;;  %1850 = vmatprep.subr.bf16.mxu0 %v1944_v16 }
 0x128   :  { %291 = vst.msk [vmem:[#allocation2 + $0x55] sm:$0x1] %vm125_vm1, %v273_v10  ;;  %259 = vst.msk [vmem:[#allocation2 + $0x54] sm:$0x1] %vm125_vm1, %v241_v11 }
 0x129   :  { %1799 = vmatmul.mubr.msk.f32.vlgmr.msra.gmra.mrb[4].mxu0 %vm638_vm2, %v618_v8 }
 0x12a   :  { %1812 = vmatprep.mubr.msk.f32.mxu0 %vm1947_vm0, %v1948_v23 }
 0x12b   :  { %v337_v12 = vpop.permute.xlu1 %336  ;;  %v305_v13 = vpop.permute.xlu0 %304 }
 0x12c   :  { %355 = vst.msk [vmem:[#allocation2 + $0x57] sm:$0x1] %vm125_vm1, %v337_v12  ;;  %323 = vst.msk [vmem:[#allocation2 + $0x56] sm:$0x1] %vm125_vm1, %v305_v13 }
 0x12f   :  { %v401_v14 = vpop.permute.xlu1 %400  ;;  %v369_v15 = vpop.permute.xlu0 %368 }
 0x130   :  { %419 = vst.msk [vmem:[#allocation2 + $0x59] sm:$0x1] %vm125_vm1, %v401_v14  ;;  %387 = vst.msk [vmem:[#allocation2 + $0x58] sm:$0x1] %vm125_vm1, %v369_v15 }
 0x133   :  { %v465_v17 = vpop.permute.xlu1 %464  ;;  %v433_v18 = vpop.permute.xlu0 %432  ;;  %v632_v29 = vld [vmem:[#allocation2 + $0x50] sm:$0xff] }
 0x134   :  { %483 = vst.msk [vmem:[#allocation2 + $0x5b] sm:$0x1] %vm125_vm1, %v465_v17  ;;  %451 = vst.msk [vmem:[#allocation2 + $0x5a] sm:$0x1] %vm125_vm1, %v433_v18 }
 0x137   :  { %v529_v20 = vpop.permute.xlu1 %528  ;;  %v497_v21 = vpop.permute.xlu0 %496 }
 0x138   :  { %547 = vst.msk [vmem:[#allocation2 + $0x5d] sm:$0x1] %vm125_vm1, %v529_v20  ;;  %515 = vst.msk [vmem:[#allocation2 + $0x5c] sm:$0x1] %vm125_vm1, %v497_v21 }
 0x13b   :  { %v593_v22 = vpop.permute.xlu1 %592  ;;  %v561_v24 = vpop.permute.xlu0 %560 }
 0x13c   :  { %611 = vst.msk [vmem:[#allocation2 + $0x5f] sm:$0x1] %vm125_vm1, %v593_v22  ;;  %579 = vst.msk [vmem:[#allocation2 + $0x5e] sm:$0x1] %vm125_vm1, %v561_v24 }
 0x13f   :  { %v147_v25 = vpop.permute.xlu1 %146  ;;  %v114_v26 = vpop.permute.xlu0 %113 }
 0x140   :  { %164 = vst.msk [vmem:[#allocation2 + $0x61] sm:$0x1] %vm125_vm1, %v147_v25  ;;  %132 = vst.msk [vmem:[#allocation2 + $0x60] sm:$0x1] %vm125_vm1, %v114_v26 }
 0x143   :  { %v211_v27 = vpop.permute.xlu1 %210  ;;  %v179_v28 = vpop.permute.xlu0 %178  ;;  %v633_v30 = vld [vmem:[#allocation2 + $0x58] sm:$0xff] }
 0x144   :  { %228 = vst.msk [vmem:[#allocation2 + $0x63] sm:$0x1] %vm125_vm1, %v211_v27  ;;  %196 = vst.msk [vmem:[#allocation2 + $0x62] sm:$0x1] %vm125_vm1, %v179_v28  ;;  %v1848_v31 = vpack.c.bf16 %v633_v30, %v632_v29 }
 0x146   :  { %1849 = vmatpush3.bf16.msra.mxu1 %v1848_v31 }
 0x147   :  { %v275_v33 = vpop.permute.xlu1 %274  ;;  %v243_v34 = vpop.permute.xlu0 %242  ;;  %1853 = vmatprep.subr.bf16.mxu1 %v1944_v16 }
 0x148   :  { %292 = vst.msk [vmem:[#allocation2 + $0x65] sm:$0x1] %vm125_vm1, %v275_v33  ;;  %260 = vst.msk [vmem:[#allocation2 + $0x64] sm:$0x1] %vm125_vm1, %v243_v34 }
 0x149   :  { %1806 = vmatmul.mubr.msk.f32.vlgmr.msra.gmra.mrb[4].mxu1 %vm638_vm2, %v619_v32 }
 0x14a   :  { %1819 = vmatprep.mubr.msk.f32.mxu1 %vm1947_vm0, %v1948_v23 }
 0x14b   :  { %v339_v35 = vpop.permute.xlu1 %338  ;;  %v307_v36 = vpop.permute.xlu0 %306 }
 0x14c   :  { %356 = vst.msk [vmem:[#allocation2 + $0x67] sm:$0x1] %vm125_vm1, %v339_v35  ;;  %324 = vst.msk [vmem:[#allocation2 + $0x66] sm:$0x1] %vm125_vm1, %v307_v36 }
 0x14f   :  { %v403_v19 = vpop.permute.xlu1 %402  ;;  %v371_v37 = vpop.permute.xlu0 %370 }
 0x150   :  { %420 = vst.msk [vmem:[#allocation2 + $0x69] sm:$0x1] %vm125_vm1, %v403_v19  ;;  %388 = vst.msk [vmem:[#allocation2 + $0x68] sm:$0x1] %vm125_vm1, %v371_v37 }
 0x153   :  { %v467_v16 = vpop.permute.xlu1 %466  ;;  %v435_v38 = vpop.permute.xlu0 %434  ;;  %v634_v45 = vld [vmem:[#allocation2 + $0x60] sm:$0xff] }
 0x154   :  { %484 = vst.msk [vmem:[#allocation2 + $0x6b] sm:$0x1] %vm125_vm1, %v467_v16  ;;  %452 = vst.msk [vmem:[#allocation2 + $0x6a] sm:$0x1] %vm125_vm1, %v435_v38 }
 0x157   :  { %v531_v39 = vpop.permute.xlu1 %530  ;;  %v499_v23 = vpop.permute.xlu0 %498 }
 0x158   :  { %548 = vst.msk [vmem:[#allocation2 + $0x6d] sm:$0x1] %vm125_vm1, %v531_v39  ;;  %516 = vst.msk [vmem:[#allocation2 + $0x6c] sm:$0x1] %vm125_vm1, %v499_v23 }
 0x15b   :  { %v595_v9 = vpop.permute.xlu1 %594  ;;  %v563_v40 = vpop.permute.xlu0 %562 }
 0x15c   :  { %612 = vst.msk [vmem:[#allocation2 + $0x6f] sm:$0x1] %vm125_vm1, %v595_v9  ;;  %580 = vst.msk [vmem:[#allocation2 + $0x6e] sm:$0x1] %vm125_vm1, %v563_v40 }
 0x15f   :  { %v149_v41 = vpop.permute.xlu1 %148  ;;  %v116_v42 = vpop.permute.xlu0 %115 }
 0x160   :  { %165 = vst.msk [vmem:[#allocation2 + $0x71] sm:$0x1] %vm125_vm1, %v149_v41  ;;  %133 = vst.msk [vmem:[#allocation2 + $0x70] sm:$0x1] %vm125_vm1, %v116_v42 }
 0x163   :  { %v213_v43 = vpop.permute.xlu1 %212  ;;  %v181_v44 = vpop.permute.xlu0 %180  ;;  %v635_v46 = vld [vmem:[#allocation2 + $0x68] sm:$0xff] }
 0x164   :  { %229 = vst.msk [vmem:[#allocation2 + $0x73] sm:$0x1] %vm125_vm1, %v213_v43  ;;  %197 = vst.msk [vmem:[#allocation2 + $0x72] sm:$0x1] %vm125_vm1, %v181_v44  ;;  %v1851_v47 = vpack.c.bf16 %v635_v46, %v634_v45 }
 0x166   :  { %1852 = vmatpush3.bf16.msra.mxu0 %v1851_v47 }
 0x167   :  { %v277_v49 = vpop.permute.xlu1 %276  ;;  %v245_v50 = vpop.permute.xlu0 %244 }
 0x168   :  { %293 = vst.msk [vmem:[#allocation2 + $0x75] sm:$0x1] %vm125_vm1, %v277_v49  ;;  %261 = vst.msk [vmem:[#allocation2 + $0x74] sm:$0x1] %vm125_vm1, %v245_v50 }
 0x169   :  { %1813 = vmatmul.mubr.msk.f32.vlgmr.msra.gmra.mrb[6].mxu0 %vm638_vm2, %v620_v48 }
 0x16b   :  { %v341_v51 = vpop.permute.xlu1 %340  ;;  %v309_v52 = vpop.permute.xlu0 %308 }
 0x16c   :  { %357 = vst.msk [vmem:[#allocation2 + $0x77] sm:$0x1] %vm125_vm1, %v341_v51  ;;  %325 = vst.msk [vmem:[#allocation2 + $0x76] sm:$0x1] %vm125_vm1, %v309_v52 }
 0x16f   :  { %v405_v53 = vpop.permute.xlu1 %404  ;;  %v373_v54 = vpop.permute.xlu0 %372 }
 0x170   :  { %421 = vst.msk [vmem:[#allocation2 + $0x79] sm:$0x1] %vm125_vm1, %v405_v53  ;;  %389 = vst.msk [vmem:[#allocation2 + $0x78] sm:$0x1] %vm125_vm1, %v373_v54 }
 0x173   :  { %v469_v55 = vpop.permute.xlu1 %468  ;;  %v437_v56 = vpop.permute.xlu0 %436  ;;  %v636_v2 = vld [vmem:[#allocation2 + $0x70] sm:$0xff] }
 0x174   :  { %485 = vst.msk [vmem:[#allocation2 + $0x7b] sm:$0x1] %vm125_vm1, %v469_v55  ;;  %453 = vst.msk [vmem:[#allocation2 + $0x7a] sm:$0x1] %vm125_vm1, %v437_v56 }
 0x177   :  { %v533_v57 = vpop.permute.xlu1 %532  ;;  %v501_v58 = vpop.permute.xlu0 %500 }
 0x178   :  { %549 = vst.msk [vmem:[#allocation2 + $0x7d] sm:$0x1] %vm125_vm1, %v533_v57  ;;  %517 = vst.msk [vmem:[#allocation2 + $0x7c] sm:$0x1] %vm125_vm1, %v501_v58 }
 0x17b   :  { %v597_v59 = vpop.permute.xlu1 %596  ;;  %v565_v60 = vpop.permute.xlu0 %564 }
 0x17c   :  { %613 = vst.msk [vmem:[#allocation2 + $0x7f] sm:$0x1] %vm125_vm1, %v597_v59  ;;  %581 = vst.msk [vmem:[#allocation2 + $0x7e] sm:$0x1] %vm125_vm1, %v565_v60 }
 0x17d   :  { %v708_v61 = vpop.f32.mrb[0].mxu0 }
 0x17e   :  { %v1235_v62 = vmul.f32 0.70710677, %v708_v61  ;;  %v1772_v63 = vpop.f32.mrb[1].mxu0  ;;  %v1227_v53 = vmul.f32 0.5, %v708_v61 }
 0x180   :  { %v1722_v0 = vclamps-f32 %v1235_v62, 4.0 }
 0x182   :  { %v1259_v1 = vmul.f32 %v1722_v0, %v1722_v0 }
 0x183   :  { %v637_v3 = vld [vmem:[#allocation2 + $0x78] sm:$0xff] }
 0x184   :  { %v1854_v4 = vpack.c.bf16 %v637_v3, %v636_v2  ;;  %v1267_v5 = vmul.f32 -2.7261424e-10, %v1259_v1  ;;  %v1371_v8 = vmul.f32 -1.45660715e-05, %v1259_v1 }
 0x186   :  { %1855 = vmatpush3.bf16.msra.mxu1 %v1854_v4  ;;  %v1275_v7 = vadd.f32 2.7706815e-08, %v1267_v5  ;;  %v1379_v11 = vadd.f32 -0.00021337405, %v1371_v8 }
 0x188   :  { %v1283_v10 = vmul.f32 %v1275_v7, %v1259_v1  ;;  %v1387_v13 = vmul.f32 %v1379_v11, %v1259_v1 }
 0x189   :  { %1820 = vmatmul.mubr.msk.f32.vlgmr.msra.gmra.mrb[6].mxu1 %vm638_vm2, %v621_v6 }
 0x18a   :  { %v1291_v12 = vadd.f32 -2.101024e-06, %v1283_v10  ;;  %v1395_v15 = vadd.f32 -0.001682827, %v1387_v13 }
 0x18c   :  { %v1299_v14 = vmul.f32 %v1291_v12, %v1259_v1  ;;  %v1403_v18 = vmul.f32 %v1395_v15, %v1259_v1 }
 0x18e   :  { %v1307_v17 = vadd.f32 -5.6925062e-05, %v1299_v14  ;;  %v1411_v21 = vadd.f32 -0.0073733293, %v1403_v18 }
 0x190   :  { %v1315_v20 = vmul.f32 %v1307_v17, %v1259_v1  ;;  %v1419_v27 = vmul.f32 %v1411_v21, %v1259_v1 }
 0x192   :  { %v1323_v22 = vadd.f32 -0.00073499064, %v1315_v20  ;;  %v1427_v31 = vadd.f32 -0.014264739, %v1419_v27 }
 0x194   :  { %v1331_v29 = vmul.f32 %v1323_v22, %v1259_v1  ;;  %1881 = vrcp.f32 %v1427_v31 }
 0x196   :  { %v1339_v34 = vadd.f32 -0.0029546, %v1331_v29 }
 0x198   :  { %v1347_v16 = vmul.f32 %v1339_v34, %v1259_v1 }
 0x19a   :  { %v1355_v40 = vadd.f32 -0.016096033, %v1347_v16 }
 0x19c   :  { %v1363_v45 = vmul.f32 %v1722_v0, %v1355_v40 }
 0x19d   :  { %v781_v24 = vpop.f32.mrb[0].mxu1 }
 0x19e   :  { %v1236_v25 = vmul.f32 0.70710677, %v781_v24  ;;  %v1779_v26 = vpop.f32.mrb[1].mxu1  ;;  %v1882_v46 = vpop.eup %1881  ;;  %v1228_v63 = vmul.f32 0.5, %v781_v24 }
 0x19f   :  { %v1436_v50 = vmul.f32 %v1882_v46, %v1363_v45 }
 0x1a0   :  { %v1723_v28 = vclamps-f32 %v1236_v25, 4.0 }
 0x1a1   :  { %v1451_v54 = vadd.f32 1.0, %v1436_v50 }
 0x1a2   :  { %v1260_v30 = vmul.f32 %v1723_v28, %v1723_v28 }
 0x1a3   :  { %v1459_v57 = vmul.f32 %v1451_v54, %v1227_v53 }
 0x1a4   :  { %v1268_v32 = vmul.f32 -2.7261424e-10, %v1260_v30  ;;  %v1372_v33 = vmul.f32 -1.45660715e-05, %v1260_v30 }
 0x1a5   :  { %v1597_v2 = vrot.slane %v1459_v57, 1 }
 0x1a6   :  { %v1276_v35 = vadd.f32 2.7706815e-08, %v1268_v32  ;;  %v1380_v36 = vadd.f32 -0.00021337405, %v1372_v33 }
 0x1a8   :  { %v1284_v19 = vmul.f32 %v1276_v35, %v1260_v30  ;;  %v1388_v37 = vmul.f32 %v1380_v36, %v1260_v30 }
 0x1aa   :  { %v1292_v38 = vadd.f32 -2.101024e-06, %v1284_v19  ;;  %v1396_v39 = vadd.f32 -0.001682827, %v1388_v37 }
 0x1ac   :  { %v1300_v23 = vmul.f32 %v1292_v38, %v1260_v30  ;;  %v1404_v9 = vmul.f32 %v1396_v39, %v1260_v30 }
 0x1ae   :  { %v1308_v41 = vadd.f32 -5.6925062e-05, %v1300_v23  ;;  %v1412_v42 = vadd.f32 -0.0073733293, %v1404_v9 }
 0x1b0   :  { %v1316_v43 = vmul.f32 %v1308_v41, %v1260_v30  ;;  %v1420_v44 = vmul.f32 %v1412_v42, %v1260_v30 }
 0x1b2   :  { %v1324_v47 = vadd.f32 -0.00073499064, %v1316_v43  ;;  %v1428_v48 = vadd.f32 -0.014264739, %v1420_v44 }
 0x1b4   :  { %v1332_v49 = vmul.f32 %v1324_v47, %v1260_v30  ;;  %1883 = vrcp.f32 %v1428_v48 }
 0x1b6   :  { %v1340_v51 = vadd.f32 -0.0029546, %v1332_v49 }
 0x1b8   :  { %v1348_v52 = vmul.f32 %v1340_v51, %v1260_v30 }
 0x1ba   :  { %v1356_v55 = vadd.f32 -0.016096033, %v1348_v52 }
 0x1bc   :  { %v1364_v56 = vmul.f32 %v1723_v28, %v1356_v55 }
 0x1bd   :  { %v854_v58 = vpop.f32.mrb[2].mxu0 }
 0x1be   :  { %v1884_v59 = vpop.eup %1883  ;;  %v1237_v60 = vmul.f32 0.70710677, %v854_v58  ;;  %v1786_v62 = vpop.f32.mrb[3].mxu0  ;;  %v1229_v19 = vmul.f32 0.5, %v854_v58 }
 0x1bf   :  { %v1438_v1 = vmul.f32 %v1884_v59, %v1364_v56 }
 0x1c0   :  { %v1724_v0 = vclamps-f32 %v1237_v60, 4.0 }
 0x1c1   :  { %v1452_v3 = vadd.f32 1.0, %v1438_v1 }
 0x1c2   :  { %v1261_v4 = vmul.f32 %v1724_v0, %v1724_v0 }
 0x1c3   :  { %v1460_v5 = vmul.f32 %v1452_v3, %v1228_v63 }
 0x1c4   :  { %v1269_v6 = vmul.f32 -2.7261424e-10, %v1261_v4  ;;  %v1373_v7 = vmul.f32 -1.45660715e-05, %v1261_v4 }
 0x1c5   :  { %v1485_v8 = vrot.slane %v1460_v5, 7  ;;  %v1598_v61 = vsel %vm1486_vm3, %v1460_v5, %v1597_v2 }
 0x1c6   :  { %v1277_v10 = vadd.f32 2.7706815e-08, %v1269_v6  ;;  %v1381_v11 = vadd.f32 -0.00021337405, %v1373_v7 }
 0x1c7   :  { %v1487_v12 = vsel %vm1486_vm3, %v1485_v8, %v1459_v57 }
 0x1c8   :  { %v1285_v13 = vmul.f32 %v1277_v10, %v1261_v4  ;;  %v1389_v14 = vmul.f32 %v1381_v11, %v1261_v4 }
 0x1ca   :  { %v1293_v15 = vadd.f32 -2.101024e-06, %v1285_v13  ;;  %v1397_v17 = vadd.f32 -0.001682827, %v1389_v14 }
 0x1cc   :  { %v1301_v18 = vmul.f32 %v1293_v15, %v1261_v4  ;;  %v1405_v20 = vmul.f32 %v1397_v17, %v1261_v4 }
 0x1ce   :  { %v1309_v21 = vadd.f32 -5.6925062e-05, %v1301_v18  ;;  %v1413_v22 = vadd.f32 -0.0073733293, %v1405_v20 }
 0x1d0   :  { %v1317_v24 = vmul.f32 %v1309_v21, %v1261_v4  ;;  %v1421_v25 = vmul.f32 %v1413_v22, %v1261_v4 }
 0x1d2   :  { %v1325_v26 = vadd.f32 -0.00073499064, %v1317_v24  ;;  %v1429_v27 = vadd.f32 -0.014264739, %v1421_v25  ;;  %v1223_v24 = vld [vmem:[%s2343_s2] sm:$0xff] }
 0x1d3   :  { %1829 = vmatprep.mubr.msk.f32.mxu1 %vm1507_vm6, %v1223_v24  ;;  %1824 = vmatprep.mubr.msk.f32.mxu0 %vm1507_vm6, %v1223_v24 }
 0x1d4   :  { %v1333_v28 = vmul.f32 %v1325_v26, %v1261_v4  ;;  %1885 = vrcp.f32 %v1429_v27  ;;  %v1226_v27 = vld [vmem:[%s2344_s3 + $0x8] sm:$0xff] }
 0x1d6   :  { %v1341_v29 = vadd.f32 -0.0029546, %v1333_v28  ;;  %v1949_v28 = vmov 0  }
 0x1d7   :  { %1879 = vset.pattern.permute.xlu0 %v1949_v28  ;;  %1880 = vset.pattern.permute.xlu1 %v1949_v28 }
 0x1d8   :  { %v1349_v30 = vmul.f32 %v1341_v29, %v1261_v4  ;;  %v1225_v29 = vld [vmem:[%s2344_s3] sm:$0xff]  ;;  %1474 = vperm.xlu0 %1879, %v1226_v27  }
 0x1d9   :  { %1469 = vperm.xlu1 %1880, %v1225_v29  }
 0x1da   :  { %v1357_v31 = vadd.f32 -0.016096033, %v1349_v30 }
 0x1dc   :  { %v1365_v32 = vmul.f32 %v1724_v0, %v1357_v31 }
 0x1dd   :  { %v927_v33 = vpop.f32.mrb[2].mxu1 }
 0x1de   :  { %v1886_v34 = vpop.eup %1885  ;;  %v1238_v35 = vmul.f32 0.70710677, %v927_v33  ;;  %v1793_v36 = vpop.f32.mrb[3].mxu1  ;;  %v1230_v5 = vmul.f32 0.5, %v927_v33 }
 0x1df   :  { %v1440_v37 = vmul.f32 %v1886_v34, %v1365_v32 }
 0x1e0   :  { %v1725_v16 = vclamps-f32 %v1238_v35, 4.0 }
 0x1e1   :  { %v1453_v38 = vadd.f32 1.0, %v1440_v37 }
 0x1e2   :  { %v1262_v39 = vmul.f32 %v1725_v16, %v1725_v16 }
 0x1e3   :  { %v1461_v23 = vmul.f32 %v1453_v38, %v1229_v19 }
 0x1e4   :  { %v1270_v9 = vmul.f32 -2.7261424e-10, %v1262_v39  ;;  %v1374_v40 = vmul.f32 -1.45660715e-05, %v1262_v39 }
 0x1e5   :  { %v1488_v41 = vrot.slane %v1461_v23, 6  ;;  %v1599_v42 = vrot.slane %v1461_v23, 7 }
 0x1e6   :  { %v1278_v43 = vadd.f32 2.7706815e-08, %v1270_v9  ;;  %v1382_v44 = vadd.f32 -0.00021337405, %v1374_v40 }
 0x1e7   :  { %v1490_v45 = vsel %vm1489_vm4, %v1488_v41, %v1487_v12  ;;  %v1600_v46 = vsel %vm1489_vm4, %v1599_v42, %v1598_v61 }
 0x1e8   :  { %v1286_v47 = vmul.f32 %v1278_v43, %v1262_v39  ;;  %v1390_v48 = vmul.f32 %v1382_v44, %v1262_v39 }
 0x1ea   :  { %v1294_v49 = vadd.f32 -2.101024e-06, %v1286_v47  ;;  %v1398_v50 = vadd.f32 -0.001682827, %v1390_v48 }
 0x1ec   :  { %v1302_v51 = vmul.f32 %v1294_v49, %v1262_v39  ;;  %v1406_v52 = vmul.f32 %v1398_v50, %v1262_v39 }
 0x1ee   :  { %v1310_v53 = vadd.f32 -5.6925062e-05, %v1302_v51  ;;  %v1414_v54 = vadd.f32 -0.0073733293, %v1406_v52 }
 0x1f0   :  { %v1318_v55 = vmul.f32 %v1310_v53, %v1262_v39  ;;  %v1422_v56 = vmul.f32 %v1414_v54, %v1262_v39 }
 0x1f2   :  { %v1326_v57 = vadd.f32 -0.00073499064, %v1318_v55  ;;  %v1430_v58 = vadd.f32 -0.014264739, %v1422_v56 }
 0x1f4   :  { %v1334_v59 = vmul.f32 %v1326_v57, %v1262_v39  ;;  %1887 = vrcp.f32 %v1430_v58 }
 0x1f6   :  { %v1342_v60 = vadd.f32 -0.0029546, %v1334_v59 }
 0x1f8   :  { %v1350_v62 = vmul.f32 %v1342_v60, %v1262_v39 }
 0x1fa   :  { %v1358_v63 = vadd.f32 -0.016096033, %v1350_v62 }
 0x1fc   :  { %v1366_v1 = vmul.f32 %v1725_v16, %v1358_v63  ;;  %v1000_v0 = vpop.f32.mrb[4].mxu0 }
 0x1fd   :  { %v1239_v2 = vmul.f32 0.70710677, %v1000_v0  ;;  %v1800_v3 = vpop.f32.mrb[5].mxu0  ;;  %v1231_v43 = vmul.f32 0.5, %v1000_v0 }
 0x1fe   :  { %v1888_v4 = vpop.eup %1887 }
 0x1ff   :  { %v1442_v6 = vmul.f32 %v1888_v4, %v1366_v1  ;;  %v1726_v7 = vclamps-f32 %v1239_v2, 4.0 }
 0x201   :  { %v1454_v8 = vadd.f32 1.0, %v1442_v6  ;;  %v1263_v61 = vmul.f32 %v1726_v7, %v1726_v7 }
 0x203   :  { %v1462_v10 = vmul.f32 %v1454_v8, %v1230_v5  ;;  %v1271_v11 = vmul.f32 -2.7261424e-10, %v1263_v61  ;;  %v1375_v12 = vmul.f32 -1.45660715e-05, %v1263_v61 }
 0x205   :  { %v1491_v13 = vrot.slane %v1462_v10, 5  ;;  %v1601_v14 = vrot.slane %v1462_v10, 6  ;;  %v1279_v15 = vadd.f32 2.7706815e-08, %v1271_v11  ;;  %v1383_v17 = vadd.f32 -0.00021337405, %v1375_v12 }
 0x207   :  { %v1493_v18 = vsel %vm1492_vm5, %v1491_v13, %v1490_v45  ;;  %v1602_v20 = vsel %vm1492_vm5, %v1601_v14, %v1600_v46  ;;  %v1287_v21 = vmul.f32 %v1279_v15, %v1263_v61  ;;  %v1391_v22 = vmul.f32 %v1383_v17, %v1263_v61 }
 0x209   :  { %v1295_v25 = vadd.f32 -2.101024e-06, %v1287_v21  ;;  %v1399_v26 = vadd.f32 -0.001682827, %v1391_v22 }
 0x20b   :  { %v1303_v30 = vmul.f32 %v1295_v25, %v1263_v61  ;;  %v1407_v31 = vmul.f32 %v1399_v26, %v1263_v61 }
 0x20d   :  { %v1311_v32 = vadd.f32 -5.6925062e-05, %v1303_v30  ;;  %v1415_v33 = vadd.f32 -0.0073733293, %v1407_v31 }
 0x20f   :  { %v1319_v34 = vmul.f32 %v1311_v32, %v1263_v61  ;;  %v1423_v35 = vmul.f32 %v1415_v33, %v1263_v61 }
 0x211   :  { %v1327_v36 = vadd.f32 -0.00073499064, %v1319_v34  ;;  %v1431_v19 = vadd.f32 -0.014264739, %v1423_v35 }
 0x213   :  { %v1335_v37 = vmul.f32 %v1327_v36, %v1263_v61  ;;  %1889 = vrcp.f32 %v1431_v19 }
 0x215   :  { %v1343_v16 = vadd.f32 -0.0029546, %v1335_v37 }
 0x217   :  { %v1351_v38 = vmul.f32 %v1343_v16, %v1263_v61 }
 0x219   :  { %v1359_v39 = vadd.f32 -0.016096033, %v1351_v38 }
 0x21b   :  { %v1367_v23 = vmul.f32 %v1726_v7, %v1359_v39 }
 0x21c   :  { %v1073_v9 = vpop.f32.mrb[4].mxu1 }
 0x21d   :  { %v1890_v40 = vpop.eup %1889  ;;  %v1240_v41 = vmul.f32 0.70710677, %v1073_v9  ;;  %v1807_v42 = vpop.f32.mrb[5].mxu1  ;;  %v1232_v15 = vmul.f32 0.5, %v1073_v9 }
 0x21e   :  { %v1444_v44 = vmul.f32 %v1890_v40, %v1367_v23 }
 0x21f   :  { %v1727_v45 = vclamps-f32 %v1240_v41, 4.0 }
 0x220   :  { %v1455_v46 = vadd.f32 1.0, %v1444_v44 }
 0x221   :  { %v1264_v47 = vmul.f32 %v1727_v45, %v1727_v45 }
 0x222   :  { %v1463_v48 = vmul.f32 %v1455_v46, %v1231_v43 }
 0x223   :  { %v1272_v49 = vmul.f32 -2.7261424e-10, %v1264_v47  ;;  %v1376_v50 = vmul.f32 -1.45660715e-05, %v1264_v47 }
 0x224   :  { %v1494_v51 = vrot.slane %v1463_v48, 4  ;;  %v1603_v52 = vrot.slane %v1463_v48, 5 }
 0x225   :  { %v1280_v53 = vadd.f32 2.7706815e-08, %v1272_v49  ;;  %v1384_v54 = vadd.f32 -0.00021337405, %v1376_v50 }
 0x226   :  { %v1496_v55 = vsel %vm1495_vm7, %v1494_v51, %v1493_v18  ;;  %v1604_v56 = vsel %vm1495_vm7, %v1603_v52, %v1602_v20 }
 0x227   :  { %v1288_v57 = vmul.f32 %v1280_v53, %v1264_v47  ;;  %v1392_v58 = vmul.f32 %v1384_v54, %v1264_v47 }
 0x229   :  { %v1296_v59 = vadd.f32 -2.101024e-06, %v1288_v57  ;;  %v1400_v60 = vadd.f32 -0.001682827, %v1392_v58 }
 0x22b   :  { %v1304_v62 = vmul.f32 %v1296_v59, %v1264_v47  ;;  %v1408_v63 = vmul.f32 %v1400_v60, %v1264_v47 }
 0x22d   :  { %v1312_v1 = vadd.f32 -5.6925062e-05, %v1304_v62  ;;  %v1416_v0 = vadd.f32 -0.0073733293, %v1408_v63 }
 0x22f   :  { %v1320_v2 = vmul.f32 %v1312_v1, %v1264_v47  ;;  %v1424_v3 = vmul.f32 %v1416_v0, %v1264_v47 }
 0x231   :  { %v1328_v4 = vadd.f32 -0.00073499064, %v1320_v2  ;;  %v1432_v5 = vadd.f32 -0.014264739, %v1424_v3 }
 0x233   :  { %v1336_v6 = vmul.f32 %v1328_v4, %v1264_v47  ;;  %1891 = vrcp.f32 %v1432_v5 }
 0x235   :  { %v1344_v7 = vadd.f32 -0.0029546, %v1336_v6 }
 0x237   :  { %v1352_v8 = vmul.f32 %v1344_v7, %v1264_v47 }
 0x239   :  { %v1360_v61 = vadd.f32 -0.016096033, %v1352_v8 }
 0x23b   :  { %v1368_v10 = vmul.f32 %v1727_v45, %v1360_v61 }
 0x23c   :  { %v1146_v11 = vpop.f32.mrb[6].mxu0 }
 0x23d   :  { %v1892_v12 = vpop.eup %1891  ;;  %v1241_v13 = vmul.f32 0.70710677, %v1146_v11  ;;  %v1814_v14 = vpop.f32.mrb[7].mxu0  ;;  %v1233_v51 = vmul.f32 0.5, %v1146_v11 }
 0x23e   :  { %v1446_v17 = vmul.f32 %v1892_v12, %v1368_v10 }
 0x23f   :  { %v1728_v18 = vclamps-f32 %v1241_v13, 4.0 }
 0x240   :  { %v1456_v20 = vadd.f32 1.0, %v1446_v17 }
 0x241   :  { %v1265_v21 = vmul.f32 %v1728_v18, %v1728_v18 }
 0x242   :  { %v1464_v22 = vmul.f32 %v1456_v20, %v1232_v15 }
 0x243   :  { %v1273_v24 = vmul.f32 -2.7261424e-10, %v1265_v21  ;;  %v1377_v25 = vmul.f32 -1.45660715e-05, %v1265_v21 }
 0x244   :  { %v1497_v26 = vrot.slane %v1464_v22, 3  ;;  %v1605_v27 = vrot.slane %v1464_v22, 4 }
 0x245   :  { %v1281_v28 = vadd.f32 2.7706815e-08, %v1273_v24  ;;  %v1385_v29 = vadd.f32 -0.00021337405, %v1377_v25 }
 0x246   :  { %v1499_v30 = vsel %vm1498_vm8, %v1497_v26, %v1496_v55  ;;  %v1606_v31 = vsel %vm1498_vm8, %v1605_v27, %v1604_v56 }
 0x247   :  { %v1289_v32 = vmul.f32 %v1281_v28, %v1265_v21  ;;  %v1393_v33 = vmul.f32 %v1385_v29, %v1265_v21  ;;  %v1224_v29 = vld [vmem:[%s2343_s2 + $0x8] sm:$0xff]  ;;  %s1950_s2 = smov 16  }
 0x249   :  { %v1297_v34 = vadd.f32 -2.101024e-06, %v1289_v32  ;;  %v1401_v35 = vadd.f32 -0.001682827, %v1393_v33 }
 0x24b   :  { %v1305_v36 = vmul.f32 %v1297_v34, %v1265_v21  ;;  %v1409_v19 = vmul.f32 %v1401_v35, %v1265_v21 }
 0x24d   :  { %v1313_v37 = vadd.f32 -5.6925062e-05, %v1305_v36  ;;  %v1417_v16 = vadd.f32 -0.0073733293, %v1409_v19 }
 0x24f   :  { %v1321_v38 = vmul.f32 %v1313_v37, %v1265_v21  ;;  %v1425_v39 = vmul.f32 %v1417_v16, %v1265_v21 }
 0x251   :  { %v1329_v23 = vadd.f32 -0.00073499064, %v1321_v38  ;;  %v1433_v9 = vadd.f32 -0.014264739, %v1425_v39 }
 0x253   :  { %v1337_v40 = vmul.f32 %v1329_v23, %v1265_v21  ;;  %1893 = vrcp.f32 %v1433_v9 }
 0x255   :  { %v1345_v41 = vadd.f32 -0.0029546, %v1337_v40 }
 0x257   :  { %v1353_v42 = vmul.f32 %v1345_v41, %v1265_v21 }
 0x258   :  { %v1470_v9 = vpop.permute.xlu1 %1469 }
 0x259   :  { %v1361_v43 = vadd.f32 -0.016096033, %v1353_v42 }
 0x25b   :  { %v1369_v44 = vmul.f32 %v1728_v18, %v1361_v43 }
 0x25c   :  { %v1219_v45 = vpop.f32.mrb[6].mxu1 }
 0x25d   :  { %v1894_v46 = vpop.eup %1893  ;;  %v1242_v47 = vmul.f32 0.70710677, %v1219_v45  ;;  %v1821_v48 = vpop.f32.mrb[7].mxu1  ;;  %v1234_v21 = vmul.f32 0.5, %v1219_v45 }
 0x25e   :  { %v1448_v49 = vmul.f32 %v1894_v46, %v1369_v44 }
 0x25f   :  { %v1729_v50 = vclamps-f32 %v1242_v47, 4.0 }
 0x260   :  { %v1457_v52 = vadd.f32 1.0, %v1448_v49 }
 0x261   :  { %v1266_v53 = vmul.f32 %v1729_v50, %v1729_v50 }
 0x262   :  { %v1465_v54 = vmul.f32 %v1457_v52, %v1233_v51 }
 0x263   :  { %v1274_v55 = vmul.f32 -2.7261424e-10, %v1266_v53  ;;  %v1378_v56 = vmul.f32 -1.45660715e-05, %v1266_v53 }
 0x264   :  { %v1500_v57 = vrot.slane %v1465_v54, 2  ;;  %v1607_v58 = vrot.slane %v1465_v54, 3 }
 0x265   :  { %v1282_v59 = vadd.f32 2.7706815e-08, %v1274_v55  ;;  %v1386_v60 = vadd.f32 -0.00021337405, %v1378_v56 }
 0x266   :  { %v1502_v62 = vsel %vm1501_vm9, %v1500_v57, %v1499_v30  ;;  %v1608_v63 = vsel %vm1501_vm9, %v1607_v58, %v1606_v31  ;;  %v1475_v30 = vpop.permute.xlu0 %1474 }
 0x267   :  { %v1290_v1 = vmul.f32 %v1282_v59, %v1266_v53  ;;  %v1394_v0 = vmul.f32 %v1386_v60, %v1266_v53 }
 0x269   :  { %v1298_v2 = vadd.f32 -2.101024e-06, %v1290_v1  ;;  %v1402_v3 = vadd.f32 -0.001682827, %v1394_v0 }
 0x26b   :  { %v1306_v4 = vmul.f32 %v1298_v2, %v1266_v53  ;;  %v1410_v5 = vmul.f32 %v1402_v3, %v1266_v53 }
 0x26d   :  { %v1314_v6 = vadd.f32 -5.6925062e-05, %v1306_v4  ;;  %v1418_v7 = vadd.f32 -0.0073733293, %v1410_v5 }
 0x26f   :  { %v1322_v8 = vmul.f32 %v1314_v6, %v1266_v53  ;;  %v1426_v61 = vmul.f32 %v1418_v7, %v1266_v53 }
 0x271   :  { %v1330_v10 = vadd.f32 -0.00073499064, %v1322_v8  ;;  %v1434_v11 = vadd.f32 -0.014264739, %v1426_v61 }
 0x273   :  { %v1338_v12 = vmul.f32 %v1330_v10, %v1266_v53  ;;  %1895 = vrcp.f32 %v1434_v11 }
 0x275   :  { %v1346_v13 = vadd.f32 -0.0029546, %v1338_v12 }
 0x277   :  { %v1354_v14 = vmul.f32 %v1346_v13, %v1266_v53 }
 0x279   :  { %v1362_v15 = vadd.f32 -0.016096033, %v1354_v14 }
 0x27b   :  { %v1370_v17 = vmul.f32 %v1729_v50, %v1362_v15 }
 0x27d   :  { %v1896_v18 = vpop.eup %1895 }
 0x27e   :  { %v1450_v20 = vmul.f32 %v1896_v18, %v1370_v17 }
 0x280   :  { %v1458_v22 = vadd.f32 1.0, %v1450_v20 }
 0x282   :  { %v1466_v24 = vmul.f32 %v1458_v22, %v1234_v21 }
 0x284   :  { %v1503_v25 = vrot.slane %v1466_v24, 1  ;;  %v1609_v26 = vrot.slane %v1466_v24, 2 }
 0x286   :  { %v1505_v27 = vsel %vm1504_vm10, %v1503_v25, %v1502_v62  ;;  %v1610_v28 = vsel %vm1504_vm10, %v1609_v26, %v1608_v63 }
 0x287   :  { %1822 = vmatprep.subr.mxu0 %v1505_v27  ;;  %1827 = vmatprep.subr.mxu1 %v1610_v28 }
 0x288   :  { %1823 = vmatpush3.msra.mxu0 %v1505_v27  ;;  %1828 = vmatpush3.msra.mxu1 %v1610_v28 }
 0x289   :  { %1830 = vmatmul.mubr.msk.f32.vlgmr.msra.gmra.mrb[8].mxu1 %vm1507_vm6, %v1224_v29  ;;  %1825 = vmatmul.mubr.msk.f32.vlgmr.msra.gmra.mrb[8].mxu0 %vm1507_vm6, %v1224_v29 }
 0x35c   :  { %v1831_v31 = vpop.f32.mrb[8].mxu1  ;;  %v1826_v32 = vpop.f32.mrb[8].mxu0 }
 0x35d   :  { %v1684_v33 = vadd.f32 %v1831_v31, %v1475_v30  ;;  %v1586_v34 = vadd.f32 %v1826_v32, %v1475_v30  ;;  %v1678_v35 = vpop.f32.mrb[9].mxu1  ;;  %v1580_v36 = vpop.f32.mrb[9].mxu0 }
 0x35e   :  { %v1581_v40 = vadd.f32 %v1580_v36, %v1470_v9  ;;  %v1679_v41 = vadd.f32 %v1678_v35, %v1470_v9 }
 0x35f   :  { %v1735_v19 = vmul.f32 -1.442695, %v1684_v33  ;;  %v1732_v37 = vmul.f32 -1.442695, %v1586_v34 }
 0x361   :  { %1897 = vpow2.f32 %v1735_v19 }
 0x362   :  { %1899 = vpow2.f32 %v1732_v37 }
 0x36b   :  { %v1898_v16 = vpop.eup %1897 }
 0x36c   :  { %v1900_v38 = vpop.eup %1899  ;;  %v1690_v39 = vadd.f32 1.0, %v1898_v16 }
 0x36d   :  { %v1592_v23 = vadd.f32 1.0, %v1900_v38 }
 0x36e   :  { %1901 = vrcp.f32 %v1690_v39 }
 0x36f   :  { %1903 = vrcp.f32 %v1592_v23 }
 0x378   :  { %v1902_v42 = vpop.eup %1901 }
 0x379   :  { %v1904_v43 = vpop.eup %1903  ;;  %v1693_v44 = vmul.f32 %v1902_v42, %v1679_v41 }
 0x37a   :  { %v1595_v45 = vmul.f32 %v1904_v43, %v1581_v40 }
 0x37b   :  { %1695 = vrot.lane.b32.xlu1 %v1693_v44, %s1950_s2 }
 0x37c   :  { %1596 = vst.msk [vmem:[#allocation3] sm:$0xff] %vm638_vm2, %v1595_v45 }
 0x3ed   :  { %v1696_v46 = vpop.permute.xlu1 %1695 }
 0x3ee   :  { %1699 = vst.msk [vmem:[#allocation3] sm:$0xff] %vm1698_vm11, %v1696_v46 }
 0x3ef   :  { %1916 = shalt.err (!%p1913_p4)
}
 0x3f0   :  { %s1917_s6 = scalar_lea.hbm %s2345_s4, 128 }
 0x3f1   :  { %p1918_p5 = scmp.ne.s32.totalorder %s2345_s4, %s1917_s6  ;;  %p1921_p6 = scmp.lt.u32.totalorder %s1917_s6, %s2345_s4 }
 0x3f3   :  { %p1923_p7 = pnand %p1921_p6, %p1918_p5 }
 0x3f5   :  { %1926 = shalt.err (!%p1923_p7)
}
 0x3f6   :  { %1709 = dma.vmem_to_hbm [thread:$0]  %s1707_s28, 128, %s2345_s4, [#allocation4]  }
 0x3f7   :  { %1927 = dma.done.wait [#allocation4], 128  }
 0x3f8   :  { %1928 = vsyncadd [#allocation4], 4294967168 }
 0x3f9   :  { %1713 = vsyncpa [#allocation4], 1 }

</bundles_post_ra>
